<compile_context>
chip_gen: v6e
topology: v6e:2x2x1
jax: 0.10.0
libtpu: 0.0.40
codegen_flags: <defaults>
</compile_context>

<pallas_src>
import functools
import math

import jax
import jax.numpy as jnp
from jax.experimental import pallas as pl
from jax.experimental.pallas import tpu as pltpu


# ----------------------------- Pallas kernel --------------------------------
def latent_encoder_kernel(
    x_ref,        # (Bt*S, Dx)
    y_ref,        # (Bt*S, 1)
    eps_ref,      # (Bt, 1, H)
    w_in_x_ref,   # (Dx, H)
    wqkv_ref,     # (L, H, 3H)   [Wq*1/sqrt(dh) | Wk | Wv]
    wf_ref,       # (L, 2H, H)   [Wf_res ; Wf_attn]
    w_heads_ref,  # (H, 3H)      [W_pen | W_mu | W_ls]
    vec_ref,      # (7+3L, H)    packed (1,H) params, see wrapper
    out_ref,      # (Bt, 1, 3H)  [mu | log_sigma | z]
    *, num_heads, num_layers, batch_tile,
):
    L = num_layers
    H = wqkv_ref.shape[1]
    S = x_ref.shape[0] // batch_tile
    dh = H // num_heads
    ln_eps = 1e-5

    vec = vec_ref[...]                         # tiny; load once
    def vrow(i):                               # (1, H) static sublane slice
        return vec[i:i + 1, :]

    def layer_norm(h, g, b):
        # single-pass moments: var = E[x^2] - E[x]^2
        m = jnp.mean(h, axis=-1, keepdims=True)
        ex2 = jnp.mean(h * h, axis=-1, keepdims=True)
        return (h - m) * jax.lax.rsqrt(ex2 - m * m + ln_eps) * g + b

    # ---- input projection: x @ Wx (K=3 matmul) + y * wy (VPU bcast) + b ----
    h = (jnp.dot(x_ref[...], w_in_x_ref[...], preferred_element_type=jnp.float32)
         + y_ref[...] * vrow(0) + vrow(1))
    h = layer_norm(h, vrow(2), vrow(3))                       # (Bt*S, H)

    # ---- self-attention layers ----
    # TODO(synk): attention dropout implemented as identity (eval / p=0.0).
    for l in range(L):
        residual = h
        # fused QKV projection, one lane-dense MXU push (Wq pre-scaled)
        qkv = jnp.dot(h, wqkv_ref[l], preferred_element_type=jnp.float32)  # (Bt*S, 3H)

        batch_o = []
        for b in range(batch_tile):
            r0, r1 = b * S, (b + 1) * S
            heads = []
            for hd in range(num_heads):
                c = hd * dh
                q = qkv[r0:r1, c:c + dh]                      # in-vreg lane slices
                k = qkv[r0:r1, H + c:H + c + dh]
                v = qkv[r0:r1, 2 * H + c:2 * H + c + dh]
                logits = jnp.einsum('qd,kd->qk', q, k,
                                    preferred_element_type=jnp.float32)    # (S, S)
                logits = logits - jnp.max(logits, axis=-1, keepdims=True)
                p = jnp.exp(logits)
                p = p / jnp.sum(p, axis=-1, keepdims=True)    # exact softmax divide
                heads.append(jnp.dot(p, v, preferred_element_type=jnp.float32))
            batch_o.append(jnp.concatenate(heads, axis=-1))   # (S, H) lane-dense
        attn = batch_o[0] if batch_tile == 1 else jnp.concatenate(batch_o, axis=0)

        # final_linear(2H -> H): [residual | attn] @ [Wf_res ; Wf_attn] + bf
        out = (jnp.dot(jnp.concatenate([residual, attn], axis=-1), wf_ref[l],
                       preferred_element_type=jnp.float32) + vrow(4 + l))
        h = layer_norm(out + residual, vrow(4 + L + l), vrow(4 + 2 * L + l))

    # ---- mean-pool over sequence (per batch row) + heads ----
    pooled = [jnp.mean(h[b * S:(b + 1) * S, :], axis=0, keepdims=True)
              for b in range(batch_tile)]
    hid = pooled[0] if batch_tile == 1 else jnp.concatenate(pooled, axis=0)  # (Bt, H)

    w_all = w_heads_ref[...]                                  # (H, 3H)
    hid = jnp.maximum(
        jnp.dot(hid, w_all[:, :H], preferred_element_type=jnp.float32)
        + vrow(4 + 3 * L), 0.0)
    # mu and log_sigma from one fused (H, 2H) matmul
    b_mu_ls = jnp.concatenate([vrow(4 + 3 * L + 1), vrow(4 + 3 * L + 2)], axis=-1)
    mu_ls = jnp.dot(hid, w_all[:, H:], preferred_element_type=jnp.float32) + b_mu_ls
    mu, ls = mu_ls[:, :H], mu_ls[:, H:]
    eps = eps_ref[...].reshape(batch_tile, H)
    z = eps * jnp.exp(0.5 * ls) + mu

    # single lane-dense store: [mu | log_sigma | z] -> (Bt, 1, 3H)
    out_ref[...] = jnp.concatenate([mu, ls, z], axis=-1).reshape(batch_tile, 1, 3 * H)


# --------------------- generation switch (best effort) -----------------------
def _tensorcores_per_chip():
    """>=2 only on multi-TC chips (e.g. v7x). Falls back to 1 (collapsed grid),
    which is correct everywhere and optimal on single-TC v5e/v6e."""
    try:
        info = pltpu.get_tpu_info()
        for name in ("num_tensorcores", "tensorcores_per_chip", "num_cores",
                     "core_count"):
            v = getattr(info, name, None)
            if isinstance(v, int) and v > 0:
                return v
    except Exception:
        pass
    try:
        v = getattr(jax.devices()[0], "num_cores", None)
        if isinstance(v, int) and v > 0:
            return v
    except Exception:
        pass
    return 1


# ------------------------------- wrapper -------------------------------------
def latent_encoder_forward(x, y, params, eps, *, num_heads, num_layers,
                           batch_parallel=None):
    B, S, Dx = x.shape
    Dy = y.shape[-1]
    assert Dy == 1, "kernel assumes out_dim == 1 (VPU-broadcast y projection)"
    H = params["w_in_x"].shape[1]
    L = num_layers
    dh = H // num_heads

    if batch_parallel is None:
        batch_parallel = (_tensorcores_per_chip() >= 2) and (B > 1)
    bt = 1 if batch_parallel else B          # batch rows handled per grid step
    grid = (B // bt,)
    sem = ("parallel",) if batch_parallel else ("arbitrary",)

    # ---- pack weights once, in plain JAX (outside the kernel) ----
    scale = 1.0 / math.sqrt(dh)
    wqkv = jnp.concatenate(
        [params["wq"] * scale, params["wk"], params["wv"]], axis=-1)   # (L, H, 3H)
    wf = jnp.concatenate([params["wf_res"], params["wf_attn"]], axis=1)  # (L, 2H, H)
    w_heads = jnp.concatenate(
        [params["w_pen"], params["w_mu"], params["w_ls"]], axis=-1)    # (H, 3H)
    vec = jnp.concatenate([
        params["w_in_y"].reshape(1, H),     # row 0
        params["b_in"],                     # row 1
        params["ln0_g"], params["ln0_b"],   # rows 2-3
        params["bf"].reshape(L, H),         # rows 4 .. 4+L-1
        params["ln_g"].reshape(L, H),       # rows 4+L .. 4+2L-1
        params["ln_b"].reshape(L, H),       # rows 4+2L .. 4+3L-1
        params["b_pen"], params["b_mu"], params["b_ls"],   # last 3 rows
    ], axis=0)                              # (7+3L, H)

    x2 = x.reshape(B * S, Dx).astype(jnp.float32)
    y2 = y.reshape(B * S, Dy).astype(jnp.float32)
    eps3 = eps.reshape(B, 1, H).astype(jnp.float32)

    def const(shape):
        return pl.BlockSpec(shape, lambda b, n=len(shape): (0,) * n)

    in_specs = [
        pl.BlockSpec((bt * S, Dx), lambda b: (b, 0)),       # x (batch rows blocked)
        pl.BlockSpec((bt * S, Dy), lambda b: (b, 0)),       # y
        pl.BlockSpec((bt, 1, H), lambda b: (b, 0, 0)),      # eps
        const((Dx, H)),                                     # w_in_x
        const((L, H, 3 * H)),                               # wqkv
        const((L, 2 * H, H)),                               # wf
        const((H, 3 * H)),                                  # w_heads
        const((7 + 3 * L, H)),                              # packed vectors
    ]
    out_specs = pl.BlockSpec((bt, 1, 3 * H), lambda b: (b, 0, 0))
    out_shape = jax.ShapeDtypeStruct((B, 1, 3 * H), jnp.float32)

    kernel = functools.partial(
        latent_encoder_kernel,
        num_heads=num_heads, num_layers=num_layers, batch_tile=bt)

    packed = pl.pallas_call(
        kernel,
        out_shape=out_shape,
        grid_spec=pltpu.PrefetchScalarGridSpec(
            num_scalar_prefetch=0, grid=grid,
            in_specs=in_specs, out_specs=out_specs),
        compiler_params=pltpu.CompilerParams(dimension_semantics=sem),
    )(x2, y2, eps3, params["w_in_x"], wqkv, wf, w_heads, vec)

    packed = packed[:, 0, :]
    return packed[:, :H], packed[:, H:2 * H], packed[:, 2 * H:]


# ------------------------- pure-JAX reference --------------------------------
def latent_encoder_ref(x, y, params, eps, *, num_heads, num_layers):
    ln_eps = 1e-5

    def layer_norm(h, g, b):
        m = jnp.mean(h, axis=-1, keepdims=True)
        v = jnp.mean((h - m) ** 2, axis=-1, keepdims=True)
        return (h - m) / jnp.sqrt(v + ln_eps) * g + b

    h = x @ params["w_in_x"] + y @ params["w_in_y"] + params["b_in"]
    h = layer_norm(h, params["ln0_g"], params["ln0_b"])
    H = params["w_in_x"].shape[1]
    d = H // num_heads
    for l in range(num_layers):
        residual = h
        q = h @ params["wq"][l]
        k = h @ params["wk"][l]
        v = h @ params["wv"][l]
        B, S, _ = q.shape
        qh = q.reshape(B, S, num_heads, d).transpose(0, 2, 1, 3)
        kh = k.reshape(B, S, num_heads, d).transpose(0, 2, 1, 3)
        vh = v.reshape(B, S, num_heads, d).transpose(0, 2, 1, 3)
        logits = jnp.einsum("bhqd,bhkd->bhqk", qh, kh) / math.sqrt(d)
        p = jax.nn.softmax(logits, axis=-1)
        o = jnp.einsum("bhqk,bhkd->bhqd", p, vh).transpose(0, 2, 1, 3).reshape(B, S, H)
        out = residual @ params["wf_res"][l] + o @ params["wf_attn"][l] + params["bf"][l]
        h = layer_norm(out + residual, params["ln_g"][l], params["ln_b"][l])
    hidden = jnp.mean(h, axis=1)
    hidden = jax.nn.relu(hidden @ params["w_pen"] + params["b_pen"])
    mu = hidden @ params["w_mu"] + params["b_mu"]
    ls = hidden @ params["w_ls"] + params["b_ls"]
    z = eps * jnp.exp(0.5 * ls) + mu
    return mu, ls, z


# ---------------------------- parameter init ---------------------------------
def init_params(key, in_dim, out_dim, hidden_dim, num_layers):
    H = hidden_dim
    Dxy = in_dim + out_dim
    keys = jax.random.split(key, 16)
    ki = iter(keys)

    def xavier(k, shape, gain=1.0, fan_in=None, fan_out=None):
        fi = shape[-2] if fan_in is None else fan_in
        fo = shape[-1] if fan_out is None else fan_out
        bound = gain * math.sqrt(6.0 / (fi + fo))
        return jax.random.uniform(k, shape, jnp.float32, -bound, bound)

    def bias(k, shape, fan_in):
        bound = 1.0 / math.sqrt(fan_in)
        return jax.random.uniform(k, shape, jnp.float32, -bound, bound)

    relu_gain = math.sqrt(2.0)
    return {
        "w_in_x": xavier(next(ki), (in_dim, H), fan_in=Dxy, fan_out=H),
        "w_in_y": xavier(next(ki), (out_dim, H), fan_in=Dxy, fan_out=H),
        "b_in": bias(next(ki), (1, H), Dxy),
        "ln0_g": jnp.ones((1, H), jnp.float32),
        "ln0_b": jnp.zeros((1, H), jnp.float32),
        "wq": xavier(next(ki), (num_layers, H, H)),
        "wk": xavier(next(ki), (num_layers, H, H)),
        "wv": xavier(next(ki), (num_layers, H, H)),
        "wf_res": xavier(next(ki), (num_layers, H, H), fan_in=2 * H, fan_out=H),
        "wf_attn": xavier(next(ki), (num_layers, H, H), fan_in=2 * H, fan_out=H),
        "bf": bias(next(ki), (num_layers, 1, H), 2 * H),
        "ln_g": jnp.ones((num_layers, 1, H), jnp.float32),
        "ln_b": jnp.zeros((num_layers, 1, H), jnp.float32),
        "w_pen": xavier(next(ki), (H, H), gain=relu_gain),
        "b_pen": bias(next(ki), (1, H), H),
        "w_mu": xavier(next(ki), (H, H)),
        "b_mu": bias(next(ki), (1, H), H),
        "w_ls": xavier(next(ki), (H, H)),
        "b_ls": bias(next(ki), (1, H), H),
    }


# --------------------------------- main ---------------------------------------
if __name__ == "__main__":
    # config (small): input_dim=3, output_dim=1, hidden_dim=32,
    #                 num_heads=4, attention_layers=2, dropout=0.0
    B, S = 2, 8
    IN_DIM, OUT_DIM, H = 3, 1, 32
    NUM_HEADS, NUM_LAYERS = 4, 2

    root = jax.random.PRNGKey(0)
    kx, ky, keps, kparam = jax.random.split(root, 4)
    x = jax.random.normal(kx, (B, S, IN_DIM), jnp.float32)
    y = jax.random.normal(ky, (B, S, OUT_DIM), jnp.float32)
    eps = jax.random.normal(keps, (B, H), jnp.float32)   # sampling noise, drawn in JAX
    params = init_params(kparam, IN_DIM, OUT_DIM, H, NUM_LAYERS)

    mu, log_sigma, z = latent_encoder_forward(
        x, y, params, eps, num_heads=NUM_HEADS, num_layers=NUM_LAYERS)
    jax.block_until_ready((mu, log_sigma, z))

    mu_r, ls_r, z_r = latent_encoder_ref(
        x, y, params, eps, num_heads=NUM_HEADS, num_layers=NUM_LAYERS)

    # Exact softmax divide restores near-parity with torch.softmax; tolerance
    # kept modest for the single-pass LayerNorm variance (E[x^2]-E[x]^2).
    TOL = dict(atol=5e-3, rtol=5e-3)
    assert mu.shape == (B, H) and log_sigma.shape == (B, H) and z.shape == (B, H)
    assert jnp.allclose(mu, mu_r, **TOL)
    assert jnp.allclose(log_sigma, ls_r, **TOL)
    assert jnp.allclose(z, z_r, **TOL)

    print("KERNEL_OK")
</pallas_src>

<mosaic_0001>
module attributes {stable_mosaic.version = 11 : i64} {
  func.func @latent_encoder_kernel(%arg0: i32, %arg1: memref<16x3xf32, #tpu.memory_space<vmem>>, %arg2: memref<16x1xf32, #tpu.memory_space<vmem>>, %arg3: memref<2x1x32xf32, #tpu.memory_space<vmem>>, %arg4: memref<3x32xf32, #tpu.memory_space<vmem>>, %arg5: memref<2x32x96xf32, #tpu.memory_space<vmem>>, %arg6: memref<2x64x32xf32, #tpu.memory_space<vmem>>, %arg7: memref<32x96xf32, #tpu.memory_space<vmem>>, %arg8: memref<13x32xf32, #tpu.memory_space<vmem>>, %arg9: memref<2x1x96xf32, #tpu.memory_space<vmem>>) attributes {dimension_semantics = [#tpu.dimension_semantics<arbitrary>], iteration_bounds = array<i64: 1>, scalar_prefetch = 0 : i64, scratch_operands = 0 : i64, tpu.core_type = #tpu.core_type<tc>, window_params = [{transform_indices = @transform_0, window_bounds = array<i64: 16, 3>}, {transform_indices = @transform_1, window_bounds = array<i64: 16, 1>}, {transform_indices = @transform_2, window_bounds = array<i64: 2, 1, 32>}, {pipeline_mode = #tpu.pipeline_mode<synchronous>, transform_indices = @transform_3, window_bounds = array<i64: 3, 32>}, {pipeline_mode = #tpu.pipeline_mode<synchronous>, transform_indices = @transform_4, window_bounds = array<i64: 2, 32, 96>}, {pipeline_mode = #tpu.pipeline_mode<synchronous>, transform_indices = @transform_5, window_bounds = array<i64: 2, 64, 32>}, {pipeline_mode = #tpu.pipeline_mode<synchronous>, transform_indices = @transform_6, window_bounds = array<i64: 32, 96>}, {pipeline_mode = #tpu.pipeline_mode<synchronous>, transform_indices = @transform_7, window_bounds = array<i64: 13, 32>}, {transform_indices = @transform_8, window_bounds = array<i64: 2, 1, 96>}]} {
    %c0 = arith.constant 0 : index
    %c0_0 = arith.constant 0 : index
    %0 = vector.load %arg8[%c0, %c0_0] : memref<13x32xf32, #tpu.memory_space<vmem>>, vector<13x32xf32>
    %c0_1 = arith.constant 0 : index
    %c0_2 = arith.constant 0 : index
    %1 = vector.load %arg1[%c0_1, %c0_2] : memref<16x3xf32, #tpu.memory_space<vmem>>, vector<16x3xf32>
    %c0_3 = arith.constant 0 : index
    %c0_4 = arith.constant 0 : index
    %2 = vector.load %arg4[%c0_3, %c0_4] : memref<3x32xf32, #tpu.memory_space<vmem>>, vector<3x32xf32>
    %cst = arith.constant dense<0.000000e+00> : vector<16x32xf32>
    %3 = tpu.matmul %1, %2, %cst {dimension_numbers = #tpu.dot_dimension_numbers<[1], [0], [0], [1], [0, 0, 1, 1], [], []>} : vector<16x3xf32>, vector<3x32xf32>, vector<16x32xf32> -> vector<16x32xf32>
    %c0_5 = arith.constant 0 : index
    %c0_6 = arith.constant 0 : index
    %4 = vector.load %arg2[%c0_5, %c0_6] : memref<16x1xf32, #tpu.memory_space<vmem>>, vector<16x1xf32>
    %5 = vector.extract_strided_slice %0 {offsets = [0, 0], sizes = [1, 32], strides = [1, 1]} : vector<13x32xf32> to vector<1x32xf32>
    %6 = vector.broadcast %4 : vector<16x1xf32> to vector<16x32xf32>
    %7 = vector.broadcast %5 : vector<1x32xf32> to vector<16x32xf32>
    %8 = arith.mulf %6, %7 : vector<16x32xf32>
    %9 = arith.addf %3, %8 : vector<16x32xf32>
    %10 = vector.extract_strided_slice %0 {offsets = [1, 0], sizes = [1, 32], strides = [1, 1]} : vector<13x32xf32> to vector<1x32xf32>
    %11 = vector.broadcast %10 : vector<1x32xf32> to vector<16x32xf32>
    %12 = arith.addf %9, %11 : vector<16x32xf32>
    %13 = vector.extract_strided_slice %0 {offsets = [2, 0], sizes = [1, 32], strides = [1, 1]} : vector<13x32xf32> to vector<1x32xf32>
    %14 = vector.extract_strided_slice %0 {offsets = [3, 0], sizes = [1, 32], strides = [1, 1]} : vector<13x32xf32> to vector<1x32xf32>
    %cst_7 = arith.constant dense<0.000000e+00> : vector<16xf32>
    %15 = vector.multi_reduction <add>, %12, %cst_7 [1] : vector<16x32xf32> to vector<16xf32>
    %16 = vector.shape_cast %15 : vector<16xf32> to vector<16x1xf32>
    %cst_8 = arith.constant 3.200000e+01 : f32
    %17 = vector.broadcast %cst_8 : f32 to vector<16x1xf32>
    %18 = arith.divf %16, %17 : vector<16x1xf32>
    %19 = arith.mulf %12, %12 : vector<16x32xf32>
    %cst_9 = arith.constant dense<0.000000e+00> : vector<16xf32>
    %20 = vector.multi_reduction <add>, %19, %cst_9 [1] : vector<16x32xf32> to vector<16xf32>
    %21 = vector.shape_cast %20 : vector<16xf32> to vector<16x1xf32>
    %cst_10 = arith.constant 3.200000e+01 : f32
    %22 = vector.broadcast %cst_10 : f32 to vector<16x1xf32>
    %23 = arith.divf %21, %22 : vector<16x1xf32>
    %24 = vector.broadcast %18 : vector<16x1xf32> to vector<16x32xf32>
    %25 = arith.subf %12, %24 : vector<16x32xf32>
    %26 = arith.mulf %18, %18 : vector<16x1xf32>
    %27 = arith.subf %23, %26 : vector<16x1xf32>
    %cst_11 = arith.constant 9.99999974E-6 : f32
    %28 = vector.broadcast %cst_11 : f32 to vector<16x1xf32>
    %29 = arith.addf %27, %28 : vector<16x1xf32>
    %30 = math.rsqrt %29 : vector<16x1xf32>
    %31 = vector.broadcast %30 : vector<16x1xf32> to vector<16x32xf32>
    %32 = arith.mulf %25, %31 : vector<16x32xf32>
    %33 = vector.broadcast %13 : vector<1x32xf32> to vector<16x32xf32>
    %34 = arith.mulf %32, %33 : vector<16x32xf32>
    %35 = vector.broadcast %14 : vector<1x32xf32> to vector<16x32xf32>
    %36 = arith.addf %34, %35 : vector<16x32xf32>
    %c0_12 = arith.constant 0 : index
    %c0_13 = arith.constant 0 : index
    %c0_14 = arith.constant 0 : index
    %37 = vector.load %arg5[%c0_12, %c0_13, %c0_14] : memref<2x32x96xf32, #tpu.memory_space<vmem>>, vector<1x32x96xf32>
    %38 = vector.shape_cast %37 : vector<1x32x96xf32> to vector<32x96xf32>
    %cst_15 = arith.constant dense<0.000000e+00> : vector<16x96xf32>
    %39 = tpu.matmul %36, %38, %cst_15 {dimension_numbers = #tpu.dot_dimension_numbers<[1], [0], [0], [1], [0, 0, 1, 1], [], []>} : vector<16x32xf32>, vector<32x96xf32>, vector<16x96xf32> -> vector<16x96xf32>
    %40 = vector.extract_strided_slice %39 {offsets = [0, 0], sizes = [8, 8], strides = [1, 1]} : vector<16x96xf32> to vector<8x8xf32>
    %41 = vector.extract_strided_slice %39 {offsets = [0, 32], sizes = [8, 8], strides = [1, 1]} : vector<16x96xf32> to vector<8x8xf32>
    %42 = vector.extract_strided_slice %39 {offsets = [0, 64], sizes = [8, 8], strides = [1, 1]} : vector<16x96xf32> to vector<8x8xf32>
    "tpu.trace_start"() <{level = 10 : i32, message = "qd,kd->qk"}> : () -> ()
    %cst_16 = arith.constant dense<0.000000e+00> : vector<8x8xf32>
    %43 = tpu.matmul %40, %41, %cst_16 {dimension_numbers = #tpu.dot_dimension_numbers<[1], [1], [0], [0], [0, 0, 1, 0], [], []>} : vector<8x8xf32>, vector<8x8xf32>, vector<8x8xf32> -> vector<8x8xf32>
    "tpu.trace_stop"() : () -> ()
    %cst_17 = arith.constant dense<0xFF800000> : vector<8xf32>
    %44 = vector.multi_reduction <maximumf>, %43, %cst_17 [1] : vector<8x8xf32> to vector<8xf32>
    %45 = vector.shape_cast %44 : vector<8xf32> to vector<8x1xf32>
    %46 = vector.broadcast %45 : vector<8x1xf32> to vector<8x8xf32>
    %47 = arith.subf %43, %46 : vector<8x8xf32>
    %48 = math.exp %47 : vector<8x8xf32>
    %cst_18 = arith.constant dense<0.000000e+00> : vector<8xf32>
    %49 = vector.multi_reduction <add>, %48, %cst_18 [1] : vector<8x8xf32> to vector<8xf32>
    %50 = vector.shape_cast %49 : vector<8xf32> to vector<8x1xf32>
    %51 = vector.broadcast %50 : vector<8x1xf32> to vector<8x8xf32>
    %52 = arith.divf %48, %51 : vector<8x8xf32>
    %cst_19 = arith.constant dense<0.000000e+00> : vector<8x8xf32>
    %53 = tpu.matmul %52, %42, %cst_19 {dimension_numbers = #tpu.dot_dimension_numbers<[1], [0], [0], [1], [0, 0, 1, 1], [], []>} : vector<8x8xf32>, vector<8x8xf32>, vector<8x8xf32> -> vector<8x8xf32>
    %54 = vector.extract_strided_slice %39 {offsets = [0, 8], sizes = [8, 8], strides = [1, 1]} : vector<16x96xf32> to vector<8x8xf32>
    %55 = vector.extract_strided_slice %39 {offsets = [0, 40], sizes = [8, 8], strides = [1, 1]} : vector<16x96xf32> to vector<8x8xf32>
    %56 = vector.extract_strided_slice %39 {offsets = [0, 72], sizes = [8, 8], strides = [1, 1]} : vector<16x96xf32> to vector<8x8xf32>
    "tpu.trace_start"() <{level = 10 : i32, message = "qd,kd->qk"}> : () -> ()
    %cst_20 = arith.constant dense<0.000000e+00> : vector<8x8xf32>
    %57 = tpu.matmul %54, %55, %cst_20 {dimension_numbers = #tpu.dot_dimension_numbers<[1], [1], [0], [0], [0, 0, 1, 0], [], []>} : vector<8x8xf32>, vector<8x8xf32>, vector<8x8xf32> -> vector<8x8xf32>
    "tpu.trace_stop"() : () -> ()
    %cst_21 = arith.constant dense<0xFF800000> : vector<8xf32>
    %58 = vector.multi_reduction <maximumf>, %57, %cst_21 [1] : vector<8x8xf32> to vector<8xf32>
    %59 = vector.shape_cast %58 : vector<8xf32> to vector<8x1xf32>
    %60 = vector.broadcast %59 : vector<8x1xf32> to vector<8x8xf32>
    %61 = arith.subf %57, %60 : vector<8x8xf32>
    %62 = math.exp %61 : vector<8x8xf32>
    %cst_22 = arith.constant dense<0.000000e+00> : vector<8xf32>
    %63 = vector.multi_reduction <add>, %62, %cst_22 [1] : vector<8x8xf32> to vector<8xf32>
    %64 = vector.shape_cast %63 : vector<8xf32> to vector<8x1xf32>
    %65 = vector.broadcast %64 : vector<8x1xf32> to vector<8x8xf32>
    %66 = arith.divf %62, %65 : vector<8x8xf32>
    %cst_23 = arith.constant dense<0.000000e+00> : vector<8x8xf32>
    %67 = tpu.matmul %66, %56, %cst_23 {dimension_numbers = #tpu.dot_dimension_numbers<[1], [0], [0], [1], [0, 0, 1, 1], [], []>} : vector<8x8xf32>, vector<8x8xf32>, vector<8x8xf32> -> vector<8x8xf32>
    %68 = vector.extract_strided_slice %39 {offsets = [0, 16], sizes = [8, 8], strides = [1, 1]} : vector<16x96xf32> to vector<8x8xf32>
    %69 = vector.extract_strided_slice %39 {offsets = [0, 48], sizes = [8, 8], strides = [1, 1]} : vector<16x96xf32> to vector<8x8xf32>
    %70 = vector.extract_strided_slice %39 {offsets = [0, 80], sizes = [8, 8], strides = [1, 1]} : vector<16x96xf32> to vector<8x8xf32>
    "tpu.trace_start"() <{level = 10 : i32, message = "qd,kd->qk"}> : () -> ()
    %cst_24 = arith.constant dense<0.000000e+00> : vector<8x8xf32>
    %71 = tpu.matmul %68, %69, %cst_24 {dimension_numbers = #tpu.dot_dimension_numbers<[1], [1], [0], [0], [0, 0, 1, 0], [], []>} : vector<8x8xf32>, vector<8x8xf32>, vector<8x8xf32> -> vector<8x8xf32>
    "tpu.trace_stop"() : () -> ()
    %cst_25 = arith.constant dense<0xFF800000> : vector<8xf32>
    %72 = vector.multi_reduction <maximumf>, %71, %cst_25 [1] : vector<8x8xf32> to vector<8xf32>
    %73 = vector.shape_cast %72 : vector<8xf32> to vector<8x1xf32>
    %74 = vector.broadcast %73 : vector<8x1xf32> to vector<8x8xf32>
    %75 = arith.subf %71, %74 : vector<8x8xf32>
    %76 = math.exp %75 : vector<8x8xf32>
    %cst_26 = arith.constant dense<0.000000e+00> : vector<8xf32>
    %77 = vector.multi_reduction <add>, %76, %cst_26 [1] : vector<8x8xf32> to vector<8xf32>
    %78 = vector.shape_cast %77 : vector<8xf32> to vector<8x1xf32>
    %79 = vector.broadcast %78 : vector<8x1xf32> to vector<8x8xf32>
    %80 = arith.divf %76, %79 : vector<8x8xf32>
    %cst_27 = arith.constant dense<0.000000e+00> : vector<8x8xf32>
    %81 = tpu.matmul %80, %70, %cst_27 {dimension_numbers = #tpu.dot_dimension_numbers<[1], [0], [0], [1], [0, 0, 1, 1], [], []>} : vector<8x8xf32>, vector<8x8xf32>, vector<8x8xf32> -> vector<8x8xf32>
    %82 = vector.extract_strided_slice %39 {offsets = [0, 24], sizes = [8, 8], strides = [1, 1]} : vector<16x96xf32> to vector<8x8xf32>
    %83 = vector.extract_strided_slice %39 {offsets = [0, 56], sizes = [8, 8], strides = [1, 1]} : vector<16x96xf32> to vector<8x8xf32>
    %84 = vector.extract_strided_slice %39 {offsets = [0, 88], sizes = [8, 8], strides = [1, 1]} : vector<16x96xf32> to vector<8x8xf32>
    "tpu.trace_start"() <{level = 10 : i32, message = "qd,kd->qk"}> : () -> ()
    %cst_28 = arith.constant dense<0.000000e+00> : vector<8x8xf32>
    %85 = tpu.matmul %82, %83, %cst_28 {dimension_numbers = #tpu.dot_dimension_numbers<[1], [1], [0], [0], [0, 0, 1, 0], [], []>} : vector<8x8xf32>, vector<8x8xf32>, vector<8x8xf32> -> vector<8x8xf32>
    "tpu.trace_stop"() : () -> ()
    %cst_29 = arith.constant dense<0xFF800000> : vector<8xf32>
    %86 = vector.multi_reduction <maximumf>, %85, %cst_29 [1] : vector<8x8xf32> to vector<8xf32>
    %87 = vector.shape_cast %86 : vector<8xf32> to vector<8x1xf32>
    %88 = vector.broadcast %87 : vector<8x1xf32> to vector<8x8xf32>
    %89 = arith.subf %85, %88 : vector<8x8xf32>
    %90 = math.exp %89 : vector<8x8xf32>
    %cst_30 = arith.constant dense<0.000000e+00> : vector<8xf32>
    %91 = vector.multi_reduction <add>, %90, %cst_30 [1] : vector<8x8xf32> to vector<8xf32>
    %92 = vector.shape_cast %91 : vector<8xf32> to vector<8x1xf32>
    %93 = vector.broadcast %92 : vector<8x1xf32> to vector<8x8xf32>
    %94 = arith.divf %90, %93 : vector<8x8xf32>
    %cst_31 = arith.constant dense<0.000000e+00> : vector<8x8xf32>
    %95 = tpu.matmul %94, %84, %cst_31 {dimension_numbers = #tpu.dot_dimension_numbers<[1], [0], [0], [1], [0, 0, 1, 1], [], []>} : vector<8x8xf32>, vector<8x8xf32>, vector<8x8xf32> -> vector<8x8xf32>
    %96 = tpu.concatenate %53, %67, %81, %95 in 1 : vector<8x8xf32>, vector<8x8xf32>, vector<8x8xf32>, vector<8x8xf32> -> vector<8x32xf32>
    %97 = vector.extract_strided_slice %39 {offsets = [8, 0], sizes = [8, 8], strides = [1, 1]} : vector<16x96xf32> to vector<8x8xf32>
    %98 = vector.extract_strided_slice %39 {offsets = [8, 32], sizes = [8, 8], strides = [1, 1]} : vector<16x96xf32> to vector<8x8xf32>
    %99 = vector.extract_strided_slice %39 {offsets = [8, 64], sizes = [8, 8], strides = [1, 1]} : vector<16x96xf32> to vector<8x8xf32>
    "tpu.trace_start"() <{level = 10 : i32, message = "qd,kd->qk"}> : () -> ()
    %cst_32 = arith.constant dense<0.000000e+00> : vector<8x8xf32>
    %100 = tpu.matmul %97, %98, %cst_32 {dimension_numbers = #tpu.dot_dimension_numbers<[1], [1], [0], [0], [0, 0, 1, 0], [], []>} : vector<8x8xf32>, vector<8x8xf32>, vector<8x8xf32> -> vector<8x8xf32>
    "tpu.trace_stop"() : () -> ()
    %cst_33 = arith.constant dense<0xFF800000> : vector<8xf32>
    %101 = vector.multi_reduction <maximumf>, %100, %cst_33 [1] : vector<8x8xf32> to vector<8xf32>
    %102 = vector.shape_cast %101 : vector<8xf32> to vector<8x1xf32>
    %103 = vector.broadcast %102 : vector<8x1xf32> to vector<8x8xf32>
    %104 = arith.subf %100, %103 : vector<8x8xf32>
    %105 = math.exp %104 : vector<8x8xf32>
    %cst_34 = arith.constant dense<0.000000e+00> : vector<8xf32>
    %106 = vector.multi_reduction <add>, %105, %cst_34 [1] : vector<8x8xf32> to vector<8xf32>
    %107 = vector.shape_cast %106 : vector<8xf32> to vector<8x1xf32>
    %108 = vector.broadcast %107 : vector<8x1xf32> to vector<8x8xf32>
    %109 = arith.divf %105, %108 : vector<8x8xf32>
    %cst_35 = arith.constant dense<0.000000e+00> : vector<8x8xf32>
    %110 = tpu.matmul %109, %99, %cst_35 {dimension_numbers = #tpu.dot_dimension_numbers<[1], [0], [0], [1], [0, 0, 1, 1], [], []>} : vector<8x8xf32>, vector<8x8xf32>, vector<8x8xf32> -> vector<8x8xf32>
    %111 = vector.extract_strided_slice %39 {offsets = [8, 8], sizes = [8, 8], strides = [1, 1]} : vector<16x96xf32> to vector<8x8xf32>
    %112 = vector.extract_strided_slice %39 {offsets = [8, 40], sizes = [8, 8], strides = [1, 1]} : vector<16x96xf32> to vector<8x8xf32>
    %113 = vector.extract_strided_slice %39 {offsets = [8, 72], sizes = [8, 8], strides = [1, 1]} : vector<16x96xf32> to vector<8x8xf32>
    "tpu.trace_start"() <{level = 10 : i32, message = "qd,kd->qk"}> : () -> ()
    %cst_36 = arith.constant dense<0.000000e+00> : vector<8x8xf32>
    %114 = tpu.matmul %111, %112, %cst_36 {dimension_numbers = #tpu.dot_dimension_numbers<[1], [1], [0], [0], [0, 0, 1, 0], [], []>} : vector<8x8xf32>, vector<8x8xf32>, vector<8x8xf32> -> vector<8x8xf32>
    "tpu.trace_stop"() : () -> ()
    %cst_37 = arith.constant dense<0xFF800000> : vector<8xf32>
    %115 = vector.multi_reduction <maximumf>, %114, %cst_37 [1] : vector<8x8xf32> to vector<8xf32>
    %116 = vector.shape_cast %115 : vector<8xf32> to vector<8x1xf32>
    %117 = vector.broadcast %116 : vector<8x1xf32> to vector<8x8xf32>
    %118 = arith.subf %114, %117 : vector<8x8xf32>
    %119 = math.exp %118 : vector<8x8xf32>
    %cst_38 = arith.constant dense<0.000000e+00> : vector<8xf32>
    %120 = vector.multi_reduction <add>, %119, %cst_38 [1] : vector<8x8xf32> to vector<8xf32>
    %121 = vector.shape_cast %120 : vector<8xf32> to vector<8x1xf32>
    %122 = vector.broadcast %121 : vector<8x1xf32> to vector<8x8xf32>
    %123 = arith.divf %119, %122 : vector<8x8xf32>
    %cst_39 = arith.constant dense<0.000000e+00> : vector<8x8xf32>
    %124 = tpu.matmul %123, %113, %cst_39 {dimension_numbers = #tpu.dot_dimension_numbers<[1], [0], [0], [1], [0, 0, 1, 1], [], []>} : vector<8x8xf32>, vector<8x8xf32>, vector<8x8xf32> -> vector<8x8xf32>
    %125 = vector.extract_strided_slice %39 {offsets = [8, 16], sizes = [8, 8], strides = [1, 1]} : vector<16x96xf32> to vector<8x8xf32>
    %126 = vector.extract_strided_slice %39 {offsets = [8, 48], sizes = [8, 8], strides = [1, 1]} : vector<16x96xf32> to vector<8x8xf32>
    %127 = vector.extract_strided_slice %39 {offsets = [8, 80], sizes = [8, 8], strides = [1, 1]} : vector<16x96xf32> to vector<8x8xf32>
    "tpu.trace_start"() <{level = 10 : i32, message = "qd,kd->qk"}> : () -> ()
    %cst_40 = arith.constant dense<0.000000e+00> : vector<8x8xf32>
    %128 = tpu.matmul %125, %126, %cst_40 {dimension_numbers = #tpu.dot_dimension_numbers<[1], [1], [0], [0], [0, 0, 1, 0], [], []>} : vector<8x8xf32>, vector<8x8xf32>, vector<8x8xf32> -> vector<8x8xf32>
    "tpu.trace_stop"() : () -> ()
    %cst_41 = arith.constant dense<0xFF800000> : vector<8xf32>
    %129 = vector.multi_reduction <maximumf>, %128, %cst_41 [1] : vector<8x8xf32> to vector<8xf32>
    %130 = vector.shape_cast %129 : vector<8xf32> to vector<8x1xf32>
    %131 = vector.broadcast %130 : vector<8x1xf32> to vector<8x8xf32>
    %132 = arith.subf %128, %131 : vector<8x8xf32>
    %133 = math.exp %132 : vector<8x8xf32>
    %cst_42 = arith.constant dense<0.000000e+00> : vector<8xf32>
    %134 = vector.multi_reduction <add>, %133, %cst_42 [1] : vector<8x8xf32> to vector<8xf32>
    %135 = vector.shape_cast %134 : vector<8xf32> to vector<8x1xf32>
    %136 = vector.broadcast %135 : vector<8x1xf32> to vector<8x8xf32>
    %137 = arith.divf %133, %136 : vector<8x8xf32>
    %cst_43 = arith.constant dense<0.000000e+00> : vector<8x8xf32>
    %138 = tpu.matmul %137, %127, %cst_43 {dimension_numbers = #tpu.dot_dimension_numbers<[1], [0], [0], [1], [0, 0, 1, 1], [], []>} : vector<8x8xf32>, vector<8x8xf32>, vector<8x8xf32> -> vector<8x8xf32>
    %139 = vector.extract_strided_slice %39 {offsets = [8, 24], sizes = [8, 8], strides = [1, 1]} : vector<16x96xf32> to vector<8x8xf32>
    %140 = vector.extract_strided_slice %39 {offsets = [8, 56], sizes = [8, 8], strides = [1, 1]} : vector<16x96xf32> to vector<8x8xf32>
    %141 = vector.extract_strided_slice %39 {offsets = [8, 88], sizes = [8, 8], strides = [1, 1]} : vector<16x96xf32> to vector<8x8xf32>
    "tpu.trace_start"() <{level = 10 : i32, message = "qd,kd->qk"}> : () -> ()
    %cst_44 = arith.constant dense<0.000000e+00> : vector<8x8xf32>
    %142 = tpu.matmul %139, %140, %cst_44 {dimension_numbers = #tpu.dot_dimension_numbers<[1], [1], [0], [0], [0, 0, 1, 0], [], []>} : vector<8x8xf32>, vector<8x8xf32>, vector<8x8xf32> -> vector<8x8xf32>
    "tpu.trace_stop"() : () -> ()
    %cst_45 = arith.constant dense<0xFF800000> : vector<8xf32>
    %143 = vector.multi_reduction <maximumf>, %142, %cst_45 [1] : vector<8x8xf32> to vector<8xf32>
    %144 = vector.shape_cast %143 : vector<8xf32> to vector<8x1xf32>
    %145 = vector.broadcast %144 : vector<8x1xf32> to vector<8x8xf32>
    %146 = arith.subf %142, %145 : vector<8x8xf32>
    %147 = math.exp %146 : vector<8x8xf32>
    %cst_46 = arith.constant dense<0.000000e+00> : vector<8xf32>
    %148 = vector.multi_reduction <add>, %147, %cst_46 [1] : vector<8x8xf32> to vector<8xf32>
    %149 = vector.shape_cast %148 : vector<8xf32> to vector<8x1xf32>
    %150 = vector.broadcast %149 : vector<8x1xf32> to vector<8x8xf32>
    %151 = arith.divf %147, %150 : vector<8x8xf32>
    %cst_47 = arith.constant dense<0.000000e+00> : vector<8x8xf32>
    %152 = tpu.matmul %151, %141, %cst_47 {dimension_numbers = #tpu.dot_dimension_numbers<[1], [0], [0], [1], [0, 0, 1, 1], [], []>} : vector<8x8xf32>, vector<8x8xf32>, vector<8x8xf32> -> vector<8x8xf32>
    %153 = tpu.concatenate %110, %124, %138, %152 in 1 : vector<8x8xf32>, vector<8x8xf32>, vector<8x8xf32>, vector<8x8xf32> -> vector<8x32xf32>
    %154 = tpu.concatenate %96, %153 in 0 : vector<8x32xf32>, vector<8x32xf32> -> vector<16x32xf32>
    %155 = tpu.concatenate %36, %154 in 1 : vector<16x32xf32>, vector<16x32xf32> -> vector<16x64xf32>
    %c0_48 = arith.constant 0 : index
    %c0_49 = arith.constant 0 : index
    %c0_50 = arith.constant 0 : index
    %156 = vector.load %arg6[%c0_48, %c0_49, %c0_50] : memref<2x64x32xf32, #tpu.memory_space<vmem>>, vector<1x64x32xf32>
    %157 = vector.shape_cast %156 : vector<1x64x32xf32> to vector<64x32xf32>
    %cst_51 = arith.constant dense<0.000000e+00> : vector<16x32xf32>
    %158 = tpu.matmul %155, %157, %cst_51 {dimension_numbers = #tpu.dot_dimension_numbers<[1], [0], [0], [1], [0, 0, 1, 1], [], []>} : vector<16x64xf32>, vector<64x32xf32>, vector<16x32xf32> -> vector<16x32xf32>
    %159 = vector.extract_strided_slice %0 {offsets = [4, 0], sizes = [1, 32], strides = [1, 1]} : vector<13x32xf32> to vector<1x32xf32>
    %160 = vector.broadcast %159 : vector<1x32xf32> to vector<16x32xf32>
    %161 = arith.addf %158, %160 : vector<16x32xf32>
    %162 = arith.addf %161, %36 : vector<16x32xf32>
    %163 = vector.extract_strided_slice %0 {offsets = [6, 0], sizes = [1, 32], strides = [1, 1]} : vector<13x32xf32> to vector<1x32xf32>
    %164 = vector.extract_strided_slice %0 {offsets = [8, 0], sizes = [1, 32], strides = [1, 1]} : vector<13x32xf32> to vector<1x32xf32>
    %cst_52 = arith.constant dense<0.000000e+00> : vector<16xf32>
    %165 = vector.multi_reduction <add>, %162, %cst_52 [1] : vector<16x32xf32> to vector<16xf32>
    %166 = vector.shape_cast %165 : vector<16xf32> to vector<16x1xf32>
    %cst_53 = arith.constant 3.200000e+01 : f32
    %167 = vector.broadcast %cst_53 : f32 to vector<16x1xf32>
    %168 = arith.divf %166, %167 : vector<16x1xf32>
    %169 = arith.mulf %162, %162 : vector<16x32xf32>
    %cst_54 = arith.constant dense<0.000000e+00> : vector<16xf32>
    %170 = vector.multi_reduction <add>, %169, %cst_54 [1] : vector<16x32xf32> to vector<16xf32>
    %171 = vector.shape_cast %170 : vector<16xf32> to vector<16x1xf32>
    %cst_55 = arith.constant 3.200000e+01 : f32
    %172 = vector.broadcast %cst_55 : f32 to vector<16x1xf32>
    %173 = arith.divf %171, %172 : vector<16x1xf32>
    %174 = vector.broadcast %168 : vector<16x1xf32> to vector<16x32xf32>
    %175 = arith.subf %162, %174 : vector<16x32xf32>
    %176 = arith.mulf %168, %168 : vector<16x1xf32>
    %177 = arith.subf %173, %176 : vector<16x1xf32>
    %cst_56 = arith.constant 9.99999974E-6 : f32
    %178 = vector.broadcast %cst_56 : f32 to vector<16x1xf32>
    %179 = arith.addf %177, %178 : vector<16x1xf32>
    %180 = math.rsqrt %179 : vector<16x1xf32>
    %181 = vector.broadcast %180 : vector<16x1xf32> to vector<16x32xf32>
    %182 = arith.mulf %175, %181 : vector<16x32xf32>
    %183 = vector.broadcast %163 : vector<1x32xf32> to vector<16x32xf32>
    %184 = arith.mulf %182, %183 : vector<16x32xf32>
    %185 = vector.broadcast %164 : vector<1x32xf32> to vector<16x32xf32>
    %186 = arith.addf %184, %185 : vector<16x32xf32>
    %c1 = arith.constant 1 : index
    %c0_57 = arith.constant 0 : index
    %c0_58 = arith.constant 0 : index
    %187 = vector.load %arg5[%c1, %c0_57, %c0_58] : memref<2x32x96xf32, #tpu.memory_space<vmem>>, vector<1x32x96xf32>
    %188 = vector.shape_cast %187 : vector<1x32x96xf32> to vector<32x96xf32>
    %cst_59 = arith.constant dense<0.000000e+00> : vector<16x96xf32>
    %189 = tpu.matmul %186, %188, %cst_59 {dimension_numbers = #tpu.dot_dimension_numbers<[1], [0], [0], [1], [0, 0, 1, 1], [], []>} : vector<16x32xf32>, vector<32x96xf32>, vector<16x96xf32> -> vector<16x96xf32>
    %190 = vector.extract_strided_slice %189 {offsets = [0, 0], sizes = [8, 8], strides = [1, 1]} : vector<16x96xf32> to vector<8x8xf32>
    %191 = vector.extract_strided_slice %189 {offsets = [0, 32], sizes = [8, 8], strides = [1, 1]} : vector<16x96xf32> to vector<8x8xf32>
    %192 = vector.extract_strided_slice %189 {offsets = [0, 64], sizes = [8, 8], strides = [1, 1]} : vector<16x96xf32> to vector<8x8xf32>
    "tpu.trace_start"() <{level = 10 : i32, message = "qd,kd->qk"}> : () -> ()
    %cst_60 = arith.constant dense<0.000000e+00> : vector<8x8xf32>
    %193 = tpu.matmul %190, %191, %cst_60 {dimension_numbers = #tpu.dot_dimension_numbers<[1], [1], [0], [0], [0, 0, 1, 0], [], []>} : vector<8x8xf32>, vector<8x8xf32>, vector<8x8xf32> -> vector<8x8xf32>
    "tpu.trace_stop"() : () -> ()
    %cst_61 = arith.constant dense<0xFF800000> : vector<8xf32>
    %194 = vector.multi_reduction <maximumf>, %193, %cst_61 [1] : vector<8x8xf32> to vector<8xf32>
    %195 = vector.shape_cast %194 : vector<8xf32> to vector<8x1xf32>
    %196 = vector.broadcast %195 : vector<8x1xf32> to vector<8x8xf32>
    %197 = arith.subf %193, %196 : vector<8x8xf32>
    %198 = math.exp %197 : vector<8x8xf32>
    %cst_62 = arith.constant dense<0.000000e+00> : vector<8xf32>
    %199 = vector.multi_reduction <add>, %198, %cst_62 [1] : vector<8x8xf32> to vector<8xf32>
    %200 = vector.shape_cast %199 : vector<8xf32> to vector<8x1xf32>
    %201 = vector.broadcast %200 : vector<8x1xf32> to vector<8x8xf32>
    %202 = arith.divf %198, %201 : vector<8x8xf32>
    %cst_63 = arith.constant dense<0.000000e+00> : vector<8x8xf32>
    %203 = tpu.matmul %202, %192, %cst_63 {dimension_numbers = #tpu.dot_dimension_numbers<[1], [0], [0], [1], [0, 0, 1, 1], [], []>} : vector<8x8xf32>, vector<8x8xf32>, vector<8x8xf32> -> vector<8x8xf32>
    %204 = vector.extract_strided_slice %189 {offsets = [0, 8], sizes = [8, 8], strides = [1, 1]} : vector<16x96xf32> to vector<8x8xf32>
    %205 = vector.extract_strided_slice %189 {offsets = [0, 40], sizes = [8, 8], strides = [1, 1]} : vector<16x96xf32> to vector<8x8xf32>
    %206 = vector.extract_strided_slice %189 {offsets = [0, 72], sizes = [8, 8], strides = [1, 1]} : vector<16x96xf32> to vector<8x8xf32>
    "tpu.trace_start"() <{level = 10 : i32, message = "qd,kd->qk"}> : () -> ()
    %cst_64 = arith.constant dense<0.000000e+00> : vector<8x8xf32>
    %207 = tpu.matmul %204, %205, %cst_64 {dimension_numbers = #tpu.dot_dimension_numbers<[1], [1], [0], [0], [0, 0, 1, 0], [], []>} : vector<8x8xf32>, vector<8x8xf32>, vector<8x8xf32> -> vector<8x8xf32>
    "tpu.trace_stop"() : () -> ()
    %cst_65 = arith.constant dense<0xFF800000> : vector<8xf32>
    %208 = vector.multi_reduction <maximumf>, %207, %cst_65 [1] : vector<8x8xf32> to vector<8xf32>
    %209 = vector.shape_cast %208 : vector<8xf32> to vector<8x1xf32>
    %210 = vector.broadcast %209 : vector<8x1xf32> to vector<8x8xf32>
    %211 = arith.subf %207, %210 : vector<8x8xf32>
    %212 = math.exp %211 : vector<8x8xf32>
    %cst_66 = arith.constant dense<0.000000e+00> : vector<8xf32>
    %213 = vector.multi_reduction <add>, %212, %cst_66 [1] : vector<8x8xf32> to vector<8xf32>
    %214 = vector.shape_cast %213 : vector<8xf32> to vector<8x1xf32>
    %215 = vector.broadcast %214 : vector<8x1xf32> to vector<8x8xf32>
    %216 = arith.divf %212, %215 : vector<8x8xf32>
    %cst_67 = arith.constant dense<0.000000e+00> : vector<8x8xf32>
    %217 = tpu.matmul %216, %206, %cst_67 {dimension_numbers = #tpu.dot_dimension_numbers<[1], [0], [0], [1], [0, 0, 1, 1], [], []>} : vector<8x8xf32>, vector<8x8xf32>, vector<8x8xf32> -> vector<8x8xf32>
    %218 = vector.extract_strided_slice %189 {offsets = [0, 16], sizes = [8, 8], strides = [1, 1]} : vector<16x96xf32> to vector<8x8xf32>
    %219 = vector.extract_strided_slice %189 {offsets = [0, 48], sizes = [8, 8], strides = [1, 1]} : vector<16x96xf32> to vector<8x8xf32>
    %220 = vector.extract_strided_slice %189 {offsets = [0, 80], sizes = [8, 8], strides = [1, 1]} : vector<16x96xf32> to vector<8x8xf32>
    "tpu.trace_start"() <{level = 10 : i32, message = "qd,kd->qk"}> : () -> ()
    %cst_68 = arith.constant dense<0.000000e+00> : vector<8x8xf32>
    %221 = tpu.matmul %218, %219, %cst_68 {dimension_numbers = #tpu.dot_dimension_numbers<[1], [1], [0], [0], [0, 0, 1, 0], [], []>} : vector<8x8xf32>, vector<8x8xf32>, vector<8x8xf32> -> vector<8x8xf32>
    "tpu.trace_stop"() : () -> ()
    %cst_69 = arith.constant dense<0xFF800000> : vector<8xf32>
    %222 = vector.multi_reduction <maximumf>, %221, %cst_69 [1] : vector<8x8xf32> to vector<8xf32>
    %223 = vector.shape_cast %222 : vector<8xf32> to vector<8x1xf32>
    %224 = vector.broadcast %223 : vector<8x1xf32> to vector<8x8xf32>
    %225 = arith.subf %221, %224 : vector<8x8xf32>
    %226 = math.exp %225 : vector<8x8xf32>
    %cst_70 = arith.constant dense<0.000000e+00> : vector<8xf32>
    %227 = vector.multi_reduction <add>, %226, %cst_70 [1] : vector<8x8xf32> to vector<8xf32>
    %228 = vector.shape_cast %227 : vector<8xf32> to vector<8x1xf32>
    %229 = vector.broadcast %228 : vector<8x1xf32> to vector<8x8xf32>
    %230 = arith.divf %226, %229 : vector<8x8xf32>
    %cst_71 = arith.constant dense<0.000000e+00> : vector<8x8xf32>
    %231 = tpu.matmul %230, %220, %cst_71 {dimension_numbers = #tpu.dot_dimension_numbers<[1], [0], [0], [1], [0, 0, 1, 1], [], []>} : vector<8x8xf32>, vector<8x8xf32>, vector<8x8xf32> -> vector<8x8xf32>
    %232 = vector.extract_strided_slice %189 {offsets = [0, 24], sizes = [8, 8], strides = [1, 1]} : vector<16x96xf32> to vector<8x8xf32>
    %233 = vector.extract_strided_slice %189 {offsets = [0, 56], sizes = [8, 8], strides = [1, 1]} : vector<16x96xf32> to vector<8x8xf32>
    %234 = vector.extract_strided_slice %189 {offsets = [0, 88], sizes = [8, 8], strides = [1, 1]} : vector<16x96xf32> to vector<8x8xf32>
    "tpu.trace_start"() <{level = 10 : i32, message = "qd,kd->qk"}> : () -> ()
    %cst_72 = arith.constant dense<0.000000e+00> : vector<8x8xf32>
    %235 = tpu.matmul %232, %233, %cst_72 {dimension_numbers = #tpu.dot_dimension_numbers<[1], [1], [0], [0], [0, 0, 1, 0], [], []>} : vector<8x8xf32>, vector<8x8xf32>, vector<8x8xf32> -> vector<8x8xf32>
    "tpu.trace_stop"() : () -> ()
    %cst_73 = arith.constant dense<0xFF800000> : vector<8xf32>
    %236 = vector.multi_reduction <maximumf>, %235, %cst_73 [1] : vector<8x8xf32> to vector<8xf32>
    %237 = vector.shape_cast %236 : vector<8xf32> to vector<8x1xf32>
    %238 = vector.broadcast %237 : vector<8x1xf32> to vector<8x8xf32>
    %239 = arith.subf %235, %238 : vector<8x8xf32>
    %240 = math.exp %239 : vector<8x8xf32>
    %cst_74 = arith.constant dense<0.000000e+00> : vector<8xf32>
    %241 = vector.multi_reduction <add>, %240, %cst_74 [1] : vector<8x8xf32> to vector<8xf32>
    %242 = vector.shape_cast %241 : vector<8xf32> to vector<8x1xf32>
    %243 = vector.broadcast %242 : vector<8x1xf32> to vector<8x8xf32>
    %244 = arith.divf %240, %243 : vector<8x8xf32>
    %cst_75 = arith.constant dense<0.000000e+00> : vector<8x8xf32>
    %245 = tpu.matmul %244, %234, %cst_75 {dimension_numbers = #tpu.dot_dimension_numbers<[1], [0], [0], [1], [0, 0, 1, 1], [], []>} : vector<8x8xf32>, vector<8x8xf32>, vector<8x8xf32> -> vector<8x8xf32>
    %246 = tpu.concatenate %203, %217, %231, %245 in 1 : vector<8x8xf32>, vector<8x8xf32>, vector<8x8xf32>, vector<8x8xf32> -> vector<8x32xf32>
    %247 = vector.extract_strided_slice %189 {offsets = [8, 0], sizes = [8, 8], strides = [1, 1]} : vector<16x96xf32> to vector<8x8xf32>
    %248 = vector.extract_strided_slice %189 {offsets = [8, 32], sizes = [8, 8], strides = [1, 1]} : vector<16x96xf32> to vector<8x8xf32>
    %249 = vector.extract_strided_slice %189 {offsets = [8, 64], sizes = [8, 8], strides = [1, 1]} : vector<16x96xf32> to vector<8x8xf32>
    "tpu.trace_start"() <{level = 10 : i32, message = "qd,kd->qk"}> : () -> ()
    %cst_76 = arith.constant dense<0.000000e+00> : vector<8x8xf32>
    %250 = tpu.matmul %247, %248, %cst_76 {dimension_numbers = #tpu.dot_dimension_numbers<[1], [1], [0], [0], [0, 0, 1, 0], [], []>} : vector<8x8xf32>, vector<8x8xf32>, vector<8x8xf32> -> vector<8x8xf32>
    "tpu.trace_stop"() : () -> ()
    %cst_77 = arith.constant dense<0xFF800000> : vector<8xf32>
    %251 = vector.multi_reduction <maximumf>, %250, %cst_77 [1] : vector<8x8xf32> to vector<8xf32>
    %252 = vector.shape_cast %251 : vector<8xf32> to vector<8x1xf32>
    %253 = vector.broadcast %252 : vector<8x1xf32> to vector<8x8xf32>
    %254 = arith.subf %250, %253 : vector<8x8xf32>
    %255 = math.exp %254 : vector<8x8xf32>
    %cst_78 = arith.constant dense<0.000000e+00> : vector<8xf32>
    %256 = vector.multi_reduction <add>, %255, %cst_78 [1] : vector<8x8xf32> to vector<8xf32>
    %257 = vector.shape_cast %256 : vector<8xf32> to vector<8x1xf32>
    %258 = vector.broadcast %257 : vector<8x1xf32> to vector<8x8xf32>
    %259 = arith.divf %255, %258 : vector<8x8xf32>
    %cst_79 = arith.constant dense<0.000000e+00> : vector<8x8xf32>
    %260 = tpu.matmul %259, %249, %cst_79 {dimension_numbers = #tpu.dot_dimension_numbers<[1], [0], [0], [1], [0, 0, 1, 1], [], []>} : vector<8x8xf32>, vector<8x8xf32>, vector<8x8xf32> -> vector<8x8xf32>
    %261 = vector.extract_strided_slice %189 {offsets = [8, 8], sizes = [8, 8], strides = [1, 1]} : vector<16x96xf32> to vector<8x8xf32>
    %262 = vector.extract_strided_slice %189 {offsets = [8, 40], sizes = [8, 8], strides = [1, 1]} : vector<16x96xf32> to vector<8x8xf32>
    %263 = vector.extract_strided_slice %189 {offsets = [8, 72], sizes = [8, 8], strides = [1, 1]} : vector<16x96xf32> to vector<8x8xf32>
    "tpu.trace_start"() <{level = 10 : i32, message = "qd,kd->qk"}> : () -> ()
    %cst_80 = arith.constant dense<0.000000e+00> : vector<8x8xf32>
    %264 = tpu.matmul %261, %262, %cst_80 {dimension_numbers = #tpu.dot_dimension_numbers<[1], [1], [0], [0], [0, 0, 1, 0], [], []>} : vector<8x8xf32>, vector<8x8xf32>, vector<8x8xf32> -> vector<8x8xf32>
    "tpu.trace_stop"() : () -> ()
    %cst_81 = arith.constant dense<0xFF800000> : vector<8xf32>
    %265 = vector.multi_reduction <maximumf>, %264, %cst_81 [1] : vector<8x8xf32> to vector<8xf32>
    %266 = vector.shape_cast %265 : vector<8xf32> to vector<8x1xf32>
    %267 = vector.broadcast %266 : vector<8x1xf32> to vector<8x8xf32>
    %268 = arith.subf %264, %267 : vector<8x8xf32>
    %269 = math.exp %268 : vector<8x8xf32>
    %cst_82 = arith.constant dense<0.000000e+00> : vector<8xf32>
    %270 = vector.multi_reduction <add>, %269, %cst_82 [1] : vector<8x8xf32> to vector<8xf32>
    %271 = vector.shape_cast %270 : vector<8xf32> to vector<8x1xf32>
    %272 = vector.broadcast %271 : vector<8x1xf32> to vector<8x8xf32>
    %273 = arith.divf %269, %272 : vector<8x8xf32>
    %cst_83 = arith.constant dense<0.000000e+00> : vector<8x8xf32>
    %274 = tpu.matmul %273, %263, %cst_83 {dimension_numbers = #tpu.dot_dimension_numbers<[1], [0], [0], [1], [0, 0, 1, 1], [], []>} : vector<8x8xf32>, vector<8x8xf32>, vector<8x8xf32> -> vector<8x8xf32>
    %275 = vector.extract_strided_slice %189 {offsets = [8, 16], sizes = [8, 8], strides = [1, 1]} : vector<16x96xf32> to vector<8x8xf32>
    %276 = vector.extract_strided_slice %189 {offsets = [8, 48], sizes = [8, 8], strides = [1, 1]} : vector<16x96xf32> to vector<8x8xf32>
    %277 = vector.extract_strided_slice %189 {offsets = [8, 80], sizes = [8, 8], strides = [1, 1]} : vector<16x96xf32> to vector<8x8xf32>
    "tpu.trace_start"() <{level = 10 : i32, message = "qd,kd->qk"}> : () -> ()
    %cst_84 = arith.constant dense<0.000000e+00> : vector<8x8xf32>
    %278 = tpu.matmul %275, %276, %cst_84 {dimension_numbers = #tpu.dot_dimension_numbers<[1], [1], [0], [0], [0, 0, 1, 0], [], []>} : vector<8x8xf32>, vector<8x8xf32>, vector<8x8xf32> -> vector<8x8xf32>
    "tpu.trace_stop"() : () -> ()
    %cst_85 = arith.constant dense<0xFF800000> : vector<8xf32>
    %279 = vector.multi_reduction <maximumf>, %278, %cst_85 [1] : vector<8x8xf32> to vector<8xf32>
    %280 = vector.shape_cast %279 : vector<8xf32> to vector<8x1xf32>
    %281 = vector.broadcast %280 : vector<8x1xf32> to vector<8x8xf32>
    %282 = arith.subf %278, %281 : vector<8x8xf32>
    %283 = math.exp %282 : vector<8x8xf32>
    %cst_86 = arith.constant dense<0.000000e+00> : vector<8xf32>
    %284 = vector.multi_reduction <add>, %283, %cst_86 [1] : vector<8x8xf32> to vector<8xf32>
    %285 = vector.shape_cast %284 : vector<8xf32> to vector<8x1xf32>
    %286 = vector.broadcast %285 : vector<8x1xf32> to vector<8x8xf32>
    %287 = arith.divf %283, %286 : vector<8x8xf32>
    %cst_87 = arith.constant dense<0.000000e+00> : vector<8x8xf32>
    %288 = tpu.matmul %287, %277, %cst_87 {dimension_numbers = #tpu.dot_dimension_numbers<[1], [0], [0], [1], [0, 0, 1, 1], [], []>} : vector<8x8xf32>, vector<8x8xf32>, vector<8x8xf32> -> vector<8x8xf32>
    %289 = vector.extract_strided_slice %189 {offsets = [8, 24], sizes = [8, 8], strides = [1, 1]} : vector<16x96xf32> to vector<8x8xf32>
    %290 = vector.extract_strided_slice %189 {offsets = [8, 56], sizes = [8, 8], strides = [1, 1]} : vector<16x96xf32> to vector<8x8xf32>
    %291 = vector.extract_strided_slice %189 {offsets = [8, 88], sizes = [8, 8], strides = [1, 1]} : vector<16x96xf32> to vector<8x8xf32>
    "tpu.trace_start"() <{level = 10 : i32, message = "qd,kd->qk"}> : () -> ()
    %cst_88 = arith.constant dense<0.000000e+00> : vector<8x8xf32>
    %292 = tpu.matmul %289, %290, %cst_88 {dimension_numbers = #tpu.dot_dimension_numbers<[1], [1], [0], [0], [0, 0, 1, 0], [], []>} : vector<8x8xf32>, vector<8x8xf32>, vector<8x8xf32> -> vector<8x8xf32>
    "tpu.trace_stop"() : () -> ()
    %cst_89 = arith.constant dense<0xFF800000> : vector<8xf32>
    %293 = vector.multi_reduction <maximumf>, %292, %cst_89 [1] : vector<8x8xf32> to vector<8xf32>
    %294 = vector.shape_cast %293 : vector<8xf32> to vector<8x1xf32>
    %295 = vector.broadcast %294 : vector<8x1xf32> to vector<8x8xf32>
    %296 = arith.subf %292, %295 : vector<8x8xf32>
    %297 = math.exp %296 : vector<8x8xf32>
    %cst_90 = arith.constant dense<0.000000e+00> : vector<8xf32>
    %298 = vector.multi_reduction <add>, %297, %cst_90 [1] : vector<8x8xf32> to vector<8xf32>
    %299 = vector.shape_cast %298 : vector<8xf32> to vector<8x1xf32>
    %300 = vector.broadcast %299 : vector<8x1xf32> to vector<8x8xf32>
    %301 = arith.divf %297, %300 : vector<8x8xf32>
    %cst_91 = arith.constant dense<0.000000e+00> : vector<8x8xf32>
    %302 = tpu.matmul %301, %291, %cst_91 {dimension_numbers = #tpu.dot_dimension_numbers<[1], [0], [0], [1], [0, 0, 1, 1], [], []>} : vector<8x8xf32>, vector<8x8xf32>, vector<8x8xf32> -> vector<8x8xf32>
    %303 = tpu.concatenate %260, %274, %288, %302 in 1 : vector<8x8xf32>, vector<8x8xf32>, vector<8x8xf32>, vector<8x8xf32> -> vector<8x32xf32>
    %304 = tpu.concatenate %246, %303 in 0 : vector<8x32xf32>, vector<8x32xf32> -> vector<16x32xf32>
    %305 = tpu.concatenate %186, %304 in 1 : vector<16x32xf32>, vector<16x32xf32> -> vector<16x64xf32>
    %c1_92 = arith.constant 1 : index
    %c0_93 = arith.constant 0 : index
    %c0_94 = arith.constant 0 : index
    %306 = vector.load %arg6[%c1_92, %c0_93, %c0_94] : memref<2x64x32xf32, #tpu.memory_space<vmem>>, vector<1x64x32xf32>
    %307 = vector.shape_cast %306 : vector<1x64x32xf32> to vector<64x32xf32>
    %cst_95 = arith.constant dense<0.000000e+00> : vector<16x32xf32>
    %308 = tpu.matmul %305, %307, %cst_95 {dimension_numbers = #tpu.dot_dimension_numbers<[1], [0], [0], [1], [0, 0, 1, 1], [], []>} : vector<16x64xf32>, vector<64x32xf32>, vector<16x32xf32> -> vector<16x32xf32>
    %309 = vector.extract_strided_slice %0 {offsets = [5, 0], sizes = [1, 32], strides = [1, 1]} : vector<13x32xf32> to vector<1x32xf32>
    %310 = vector.broadcast %309 : vector<1x32xf32> to vector<16x32xf32>
    %311 = arith.addf %308, %310 : vector<16x32xf32>
    %312 = arith.addf %311, %186 : vector<16x32xf32>
    %313 = vector.extract_strided_slice %0 {offsets = [7, 0], sizes = [1, 32], strides = [1, 1]} : vector<13x32xf32> to vector<1x32xf32>
    %314 = vector.extract_strided_slice %0 {offsets = [9, 0], sizes = [1, 32], strides = [1, 1]} : vector<13x32xf32> to vector<1x32xf32>
    %cst_96 = arith.constant dense<0.000000e+00> : vector<16xf32>
    %315 = vector.multi_reduction <add>, %312, %cst_96 [1] : vector<16x32xf32> to vector<16xf32>
    %316 = vector.shape_cast %315 : vector<16xf32> to vector<16x1xf32>
    %cst_97 = arith.constant 3.200000e+01 : f32
    %317 = vector.broadcast %cst_97 : f32 to vector<16x1xf32>
    %318 = arith.divf %316, %317 : vector<16x1xf32>
    %319 = arith.mulf %312, %312 : vector<16x32xf32>
    %cst_98 = arith.constant dense<0.000000e+00> : vector<16xf32>
    %320 = vector.multi_reduction <add>, %319, %cst_98 [1] : vector<16x32xf32> to vector<16xf32>
    %321 = vector.shape_cast %320 : vector<16xf32> to vector<16x1xf32>
    %cst_99 = arith.constant 3.200000e+01 : f32
    %322 = vector.broadcast %cst_99 : f32 to vector<16x1xf32>
    %323 = arith.divf %321, %322 : vector<16x1xf32>
    %324 = vector.broadcast %318 : vector<16x1xf32> to vector<16x32xf32>
    %325 = arith.subf %312, %324 : vector<16x32xf32>
    %326 = arith.mulf %318, %318 : vector<16x1xf32>
    %327 = arith.subf %323, %326 : vector<16x1xf32>
    %cst_100 = arith.constant 9.99999974E-6 : f32
    %328 = vector.broadcast %cst_100 : f32 to vector<16x1xf32>
    %329 = arith.addf %327, %328 : vector<16x1xf32>
    %330 = math.rsqrt %329 : vector<16x1xf32>
    %331 = vector.broadcast %330 : vector<16x1xf32> to vector<16x32xf32>
    %332 = arith.mulf %325, %331 : vector<16x32xf32>
    %333 = vector.broadcast %313 : vector<1x32xf32> to vector<16x32xf32>
    %334 = arith.mulf %332, %333 : vector<16x32xf32>
    %335 = vector.broadcast %314 : vector<1x32xf32> to vector<16x32xf32>
    %336 = arith.addf %334, %335 : vector<16x32xf32>
    %337 = vector.extract_strided_slice %336 {offsets = [0, 0], sizes = [8, 32], strides = [1, 1]} : vector<16x32xf32> to vector<8x32xf32>
    %cst_101 = arith.constant dense<0.000000e+00> : vector<32xf32>
    %338 = vector.multi_reduction <add>, %337, %cst_101 [0] : vector<8x32xf32> to vector<32xf32>
    %339 = vector.shape_cast %338 : vector<32xf32> to vector<1x32xf32>
    %cst_102 = arith.constant 8.000000e+00 : f32
    %340 = vector.broadcast %cst_102 : f32 to vector<1x32xf32>
    %341 = arith.divf %339, %340 : vector<1x32xf32>
    %342 = vector.extract_strided_slice %336 {offsets = [8, 0], sizes = [8, 32], strides = [1, 1]} : vector<16x32xf32> to vector<8x32xf32>
    %cst_103 = arith.constant dense<0.000000e+00> : vector<32xf32>
    %343 = vector.multi_reduction <add>, %342, %cst_103 [0] : vector<8x32xf32> to vector<32xf32>
    %344 = vector.shape_cast %343 : vector<32xf32> to vector<1x32xf32>
    %cst_104 = arith.constant 8.000000e+00 : f32
    %345 = vector.broadcast %cst_104 : f32 to vector<1x32xf32>
    %346 = arith.divf %344, %345 : vector<1x32xf32>
    %347 = tpu.concatenate %341, %346 in 0 : vector<1x32xf32>, vector<1x32xf32> -> vector<2x32xf32>
    %c0_105 = arith.constant 0 : index
    %c0_106 = arith.constant 0 : index
    %348 = vector.load %arg7[%c0_105, %c0_106] : memref<32x96xf32, #tpu.memory_space<vmem>>, vector<32x96xf32>
    %349 = vector.extract_strided_slice %348 {offsets = [0, 0], sizes = [32, 32], strides = [1, 1]} : vector<32x96xf32> to vector<32x32xf32>
    %cst_107 = arith.constant dense<0.000000e+00> : vector<2x32xf32>
    %350 = tpu.matmul %347, %349, %cst_107 {dimension_numbers = #tpu.dot_dimension_numbers<[1], [0], [0], [1], [0, 0, 1, 1], [], []>} : vector<2x32xf32>, vector<32x32xf32>, vector<2x32xf32> -> vector<2x32xf32>
    %351 = vector.extract_strided_slice %0 {offsets = [10, 0], sizes = [1, 32], strides = [1, 1]} : vector<13x32xf32> to vector<1x32xf32>
    %352 = vector.broadcast %351 : vector<1x32xf32> to vector<2x32xf32>
    %353 = arith.addf %350, %352 : vector<2x32xf32>
    %cst_108 = arith.constant 0.000000e+00 : f32
    %354 = vector.broadcast %cst_108 : f32 to vector<2x32xf32>
    %355 = arith.maximumf %353, %354 : vector<2x32xf32>
    %356 = vector.extract_strided_slice %0 {offsets = [11, 0], sizes = [1, 32], strides = [1, 1]} : vector<13x32xf32> to vector<1x32xf32>
    %357 = vector.extract_strided_slice %0 {offsets = [12, 0], sizes = [1, 32], strides = [1, 1]} : vector<13x32xf32> to vector<1x32xf32>
    %358 = tpu.concatenate %356, %357 in 1 : vector<1x32xf32>, vector<1x32xf32> -> vector<1x64xf32>
    %359 = vector.extract_strided_slice %348 {offsets = [0, 32], sizes = [32, 64], strides = [1, 1]} : vector<32x96xf32> to vector<32x64xf32>
    %cst_109 = arith.constant dense<0.000000e+00> : vector<2x64xf32>
    %360 = tpu.matmul %355, %359, %cst_109 {dimension_numbers = #tpu.dot_dimension_numbers<[1], [0], [0], [1], [0, 0, 1, 1], [], []>} : vector<2x32xf32>, vector<32x64xf32>, vector<2x64xf32> -> vector<2x64xf32>
    %361 = vector.broadcast %358 : vector<1x64xf32> to vector<2x64xf32>
    %362 = arith.addf %360, %361 : vector<2x64xf32>
    %363 = vector.extract_strided_slice %362 {offsets = [0, 0], sizes = [2, 32], strides = [1, 1]} : vector<2x64xf32> to vector<2x32xf32>
    %364 = vector.extract_strided_slice %362 {offsets = [0, 32], sizes = [2, 32], strides = [1, 1]} : vector<2x64xf32> to vector<2x32xf32>
    %c0_110 = arith.constant 0 : index
    %c0_111 = arith.constant 0 : index
    %c0_112 = arith.constant 0 : index
    %365 = vector.load %arg3[%c0_110, %c0_111, %c0_112] : memref<2x1x32xf32, #tpu.memory_space<vmem>>, vector<2x1x32xf32>
    %366 = vector.shape_cast %365 : vector<2x1x32xf32> to vector<2x32xf32>
    %cst_113 = arith.constant 5.000000e-01 : f32
    %367 = vector.broadcast %cst_113 : f32 to vector<2x32xf32>
    %368 = arith.mulf %367, %364 : vector<2x32xf32>
    %369 = math.exp %368 : vector<2x32xf32>
    %370 = arith.mulf %366, %369 : vector<2x32xf32>
    %371 = arith.addf %370, %363 : vector<2x32xf32>
    %372 = tpu.concatenate %363, %364, %371 in 1 : vector<2x32xf32>, vector<2x32xf32>, vector<2x32xf32> -> vector<2x96xf32>
    %373 = vector.shape_cast %372 : vector<2x96xf32> to vector<2x1x96xf32>
    %c0_114 = arith.constant 0 : index
    %c0_115 = arith.constant 0 : index
    %c0_116 = arith.constant 0 : index
    %374 = vector.load %arg9[%c0_114, %c0_115, %c0_116] : memref<2x1x96xf32, #tpu.memory_space<vmem>>, vector<2x1x96xf32>
    tpu.vector_store %arg9[%c0_114, %c0_115, %c0_116], %373 {strides = array<i32>} : memref<2x1x96xf32, #tpu.memory_space<vmem>>, vector<2x1x96xf32>,
    return
  }
  func.func @transform_0(%arg0: i32) -> (i32, i32) {
    %c0_i32 = arith.constant 0 : i32
    %c0_i32_0 = arith.constant 0 : i32
    return %arg0, %c0_i32 : i32, i32
  }
  func.func @transform_1(%arg0: i32) -> (i32, i32) {
    %c0_i32 = arith.constant 0 : i32
    %c0_i32_0 = arith.constant 0 : i32
    return %arg0, %c0_i32 : i32, i32
  }
  func.func @transform_2(%arg0: i32) -> (i32, i32, i32) {
    %c0_i32 = arith.constant 0 : i32
    %c0_i32_0 = arith.constant 0 : i32
    %c0_i32_1 = arith.constant 0 : i32
    return %arg0, %c0_i32, %c0_i32_0 : i32, i32, i32
  }
  func.func @transform_3(%arg0: i32) -> (i32, i32) {
    %c0_i32 = arith.constant 0 : i32
    %c0_i32_0 = arith.constant 0 : i32
    %c0_i32_1 = arith.constant 0 : i32
    return %c0_i32, %c0_i32_0 : i32, i32
  }
  func.func @transform_4(%arg0: i32) -> (i32, i32, i32) {
    %c0_i32 = arith.constant 0 : i32
    %c0_i32_0 = arith.constant 0 : i32
    %c0_i32_1 = arith.constant 0 : i32
    %c0_i32_2 = arith.constant 0 : i32
    return %c0_i32, %c0_i32_0, %c0_i32_1 : i32, i32, i32
  }
  func.func @transform_5(%arg0: i32) -> (i32, i32, i32) {
    %c0_i32 = arith.constant 0 : i32
    %c0_i32_0 = arith.constant 0 : i32
    %c0_i32_1 = arith.constant 0 : i32
    %c0_i32_2 = arith.constant 0 : i32
    return %c0_i32, %c0_i32_0, %c0_i32_1 : i32, i32, i32
  }
  func.func @transform_6(%arg0: i32) -> (i32, i32) {
    %c0_i32 = arith.constant 0 : i32
    %c0_i32_0 = arith.constant 0 : i32
    %c0_i32_1 = arith.constant 0 : i32
    return %c0_i32, %c0_i32_0 : i32, i32
  }
  func.func @transform_7(%arg0: i32) -> (i32, i32) {
    %c0_i32 = arith.constant 0 : i32
    %c0_i32_0 = arith.constant 0 : i32
    %c0_i32_1 = arith.constant 0 : i32
    return %c0_i32, %c0_i32_0 : i32, i32
  }
  func.func @transform_8(%arg0: i32) -> (i32, i32, i32) {
    %c0_i32 = arith.constant 0 : i32
    %c0_i32_0 = arith.constant 0 : i32
    %c0_i32_1 = arith.constant 0 : i32
    return %arg0, %c0_i32, %c0_i32_0 : i32, i32, i32
  }
}

</mosaic_0001>

<bundles_post_ra>
// kernel: tpu_custom_call.1
= control target key start
LH: loop header
LB: loop body
LE: loop exit
PB: predicated region body
PF: predicated region fallthrough
CT: control target
= control target key end

     0   :  { %vm60_vm0 = vcmask 1042432   ;;  %vm53_vm1 = vcmask 23552   ;;  %v4235_v4 = vmov 0   ;;  %s4870_s0 = inlined_call_operand.vmem [shape: f32[16,3], index: 0, kind: input, shape index: {}]   ;;  %s4871_s1 = inlined_call_operand.vmem [shape: f32[16,1], index: 1, kind: input, shape index: {}]   ;;  %s4872_s2 = inlined_call_operand.vmem [shape: f32[2,1,32], index: 2, kind: input, shape index: {}]   ;;  %s4873_s3 = inlined_call_operand.vmem [shape: f32[3,32], index: 3, kind: input, shape index: {}]   ;;  %s4874_s4 = inlined_call_operand.vmem [shape: f32[2,32,96], index: 4, kind: input, shape index: {}]   ;;  %s4875_s5 = inlined_call_operand.vmem [shape: f32[2,64,32], index: 5, kind: input, shape index: {}]   ;;  %s4876_s6 = inlined_call_operand.vmem [shape: f32[32,96], index: 6, kind: input, shape index: {}]   ;;  %s4877_s7 = inlined_call_operand.vmem [shape: f32[13,32], index: 7, kind: input, shape index: {}]   ;;  %s4878_s8 = inlined_call_operand.hbm [shape: f32[2,1,96], index: 8, kind: output, shape index: {}]  }
   0x1   :  { %v34_v0 = vld [vmem:[%s4873_s3] sm:$0x7]  ;;  %v33_v2 = vld [vmem:[%s4870_s0 + $0x8] sm:$0xff]  ;;  %4133 = vset.pattern.permute.xlu0 %v4235_v4 }
   0x2   :  { %v32_v1 = vld [vmem:[%s4870_s0] sm:$0xff]  ;;  %3865 = vmatprep.subr.msk.mxu0 %vm60_vm0, %v34_v0 }
   0x3   :  { %3867 = vmatprep.mubr.msk.f32.mxu0 %vm53_vm1, %v32_v1  ;;  %v35_v3 = vld [vmem:[%s4871_s1] sm:$0xff]  ;;  %3866 = vmatpush3.msk.msra.mxu0 %vm60_vm0, %v34_v0 }
   0x4   :  { %13 = vsyncpa [#allocation3], 0  ;;  %3868 = vmatmul.mubr.msk.f32.vlgmr.msra.gmra.mxu0 %vm53_vm1, %v33_v2  ;;  %39 = vperm.xlu0 %4133, %v35_v3   ;;  %v36_v5 = vld [vmem:[%s4871_s1 + $0x8] sm:$0xff]  ;;  %v47_v6 = vlaneseq  ;;  %v4322_v10 = vld [vmem:[%s4877_s7] sm:$0xff]  ;;  %vm145_vm2 = vcmask 261120   ;;  %v4236_v61 = vmov 0.0  }
   0x5   :  { %v192_v29 = vld [vmem:[%s4874_s4 + $0x18] sm:$0xff]  ;;  %v191_v30 = vld [vmem:[%s4874_s4 + $0x10] sm:$0xff]  ;;  %v190_v31 = vld [vmem:[%s4874_s4 + $0x8] sm:$0xff]  ;;  %3881 = vmatprep.subr.mxu0 %v4236_v61  ;;  %vm4237_vm3 = vmmov 0   ;;  %s4238_s22 = smov 112   ;;  %s4239_s23 = smov 96  }
   0x6   :  { %v4316_v7 = vshrl.u32 %v47_v6, 7  ;;  %3870 = vmatprep.subr.mxu1 %v192_v29  ;;  %v189_v32 = vld [vmem:[%s4874_s4] sm:$0xff]  ;;  %3883 = vmatprep.mubr.msk.f32.mxu0 %vm4237_vm3, %v4236_v61  ;;  %s4240_s24 = smov 80   ;;  %s4241_s25 = smov 88   ;;  %vm277_vm4 = vcmask 64512   ;;  %vm947_vm5 = vcmask 130048  }
   0x7   :  { %3871 = vmatpush3.msra.mxu1 %v192_v29  ;;  %s4242_s26 = smov 72   ;;  %s4243_s27 = smov 120   ;;  %vm949_vm6 = vcmask 195584   ;;  %vm1647_vm7 = vcmask 523264   ;;  %vm3372_vm8 = vcmask 1040384   ;;  %vm3664_vm9 = vcmask 778240  }
   0x8   :  { %44 = vperm.xlu0 %4133, %v36_v5   ;;  %v49_v9 = vsub.s32 0, %v4316_v7  ;;  %v141_v12 = vsub.s32 1, %v4316_v7  ;;  %3872 = vmatprep.subr.mxu1 %v191_v30  ;;  %v179_v47 = vsub.s32 2, %v4316_v7  ;;  %v185_v48 = vsub.s32 3, %v4316_v7  ;;  %s4244_s28 = smov 64   ;;  %s4245_s29 = smov 104  }
   0x9   :  { %3873 = vmatpush3.msra.mxu1 %v191_v30  ;;  %s4246_s30 = smov 56   ;;  %s4247_s9 = smov 40  }
   0xa   :  { %v50_v11 = vrot.slane %v4322_v10, %v49_v9  ;;  %v142_v15 = vrot.slane %v4322_v10, %v141_v12  ;;  %3874 = vmatprep.subr.mxu1 %v190_v31  ;;  %v180_v50 = vrot.slane %v4322_v10, %v179_v47  ;;  %v186_v54 = vrot.slane %v4322_v10, %v185_v48  ;;  %s4248_s10 = smov 48   ;;  %s4249_s11 = smov 8  }
   0xb   :  { %3875 = vmatpush3.msra.mxu1 %v190_v31  ;;  %s4250_s12 = smov 16   ;;  %s4251_s3 = smov 24  }
   0xc   :  { %3876 = vmatprep.subr.mxu1 %v189_v32  ;;  %s4252_s1 = smov 32  }
   0xd   :  { %3877 = vmatpush3.msra.mxu1 %v189_v32 }
   0xe   :  { %3891 = vmatprep.subr.mxu1 %v4236_v61 }
  0x7f   :  { %v40_v8 = vpop.permute.xlu0 %39 }
  0x80   :  { %v51_v17 = vmul.f32 %v50_v11, %v40_v8 }
  0x83   :  { %v45_v13 = vpop.permute.xlu0 %44 }
  0x84   :  { %v52_v14 = vmul.f32 %v50_v11, %v45_v13 }
  0xc4   :  { %v3869_v16 = vpop.f32.mrf.mxu0 }
  0xc5   :  { %v136_v18 = vadd.f32 %v3869_v16, %v52_v14 }
  0xc6   :  { %v130_v19 = vpop.f32.mrf.mxu0 }
  0xc7   :  { %v144_v20 = vadd.f32 %v142_v15, %v136_v18  ;;  %v131_v21 = vadd.f32 %v130_v19, %v51_v17 }
  0xc9   :  { %v143_v22 = vadd.f32 %v142_v15, %v131_v21  ;;  %v149_v23 = vsel %vm145_vm2, %v144_v20, 0.0  ;;  %v156_v27 = vmul.f32 %v144_v20, %v144_v20 }
  0xca   :  { %150 = vadd.xlane.f32.xlu1 %v149_v23 }
  0xcb   :  { %v155_v24 = vmul.f32 %v143_v22, %v143_v22  ;;  %v146_v26 = vsel %vm145_vm2, %v143_v22, 0.0  ;;  %v160_v28 = vsel %vm145_vm2, %v156_v27, 0.0 }
  0xcd   :  { %v157_v25 = vsel %vm145_vm2, %v155_v24, 0.0 }
  0xce   :  { %158 = vadd.xlane.f32.xlu0 %v157_v25  ;;  %147 = vadd.xlane.f32.xlu1 %v146_v26 }
  0xd2   :  { %161 = vadd.xlane.f32.xlu1 %v160_v28 }
 0x153   :  { %v151_v33 = vpop.xlane.xlu1 %150 }
 0x154   :  { %v154_v36 = vmul.f32 0.03125, %v151_v33 }
 0x156   :  { %v168_v41 = vmul.f32 %v154_v36, %v154_v36  ;;  %v166_v52 = vsub.f32 %v144_v20, %v154_v36 }
 0x157   :  { %v159_v34 = vpop.xlane.xlu0 %158  ;;  %v148_v35 = vpop.xlane.xlu1 %147 }
 0x158   :  { %v153_v37 = vmul.f32 0.03125, %v148_v35  ;;  %v163_v38 = vmul.f32 0.03125, %v159_v34 }
 0x15a   :  { %v167_v39 = vmul.f32 %v153_v37, %v153_v37  ;;  %v165_v49 = vsub.f32 %v143_v22, %v153_v37 }
 0x15b   :  { %v162_v40 = vpop.xlane.xlu1 %161 }
 0x15c   :  { %v169_v42 = vsub.f32 %v163_v38, %v167_v39  ;;  %v164_v43 = vmul.f32 0.03125, %v162_v40 }
 0x15e   :  { %v171_v44 = vadd.f32 1e-05, %v169_v42  ;;  %v170_v45 = vsub.f32 %v164_v43, %v168_v41 }
 0x160   :  { %4134 = vrsqrt.f32 %v171_v44  ;;  %v172_v46 = vadd.f32 1e-05, %v170_v45 }
 0x162   :  { %4136 = vrsqrt.f32 %v172_v46 }
 0x16d   :  { %v4135_v51 = vpop.eup %4134 }
 0x16e   :  { %v175_v53 = vmul.f32 %v4135_v51, %v165_v49 }
 0x16f   :  { %v4137_v55 = vpop.eup %4136 }
 0x170   :  { %v181_v56 = vmul.f32 %v180_v50, %v175_v53  ;;  %v176_v57 = vmul.f32 %v4137_v55, %v166_v52 }
 0x172   :  { %v4355_v58 = vadd.f32 %v186_v54, %v181_v56  ;;  %v182_v59 = vmul.f32 %v180_v50, %v176_v57 }
 0x174   :  { %3878 = vmatprep.mubr.msk.f32.mxu1 %vm145_vm2, %v4355_v58  ;;  %v4359_v60 = vadd.f32 %v186_v54, %v182_v59 }
 0x176   :  { %3879 = vmatmul.mubr.msk.f32.vlgmr.msra.gmra.mxu1 %vm145_vm2, %v4359_v60 }
 0x177   :  { %3893 = vmatprep.mubr.msk.f32.mxu1 %vm4237_vm3, %v4236_v61 }
 0x236   :  { %v4369_v62 = vpop.f32.mrf.mxu1 }
 0x238   :  { %v4371_v63 = vpop.f32.mrf.mxu1 }
 0x239   :  { %604 = vrot.lane.b32.xlu0 %v4371_v63, %s4238_s22  ;;  %275 = vrot.lane.b32.xlu1 %v4371_v63, %s4239_s23 }
 0x23d   :  { %1282 = vrot.lane.b32.xlu0 %v4369_v62, %s4240_s24  ;;  %441 = vrot.lane.b32.xlu1 %v4371_v63, %s4241_s25 }
 0x241   :  { %1447 = vrot.lane.b32.xlu0 %v4369_v62, %s4242_s26  ;;  %439 = vrot.lane.b32.xlu1 %v4371_v63, %s4243_s27 }
 0x245   :  { %363 = vrot.lane.b32.xlu0 %v4371_v63, %s4244_s28  ;;  %606 = vrot.lane.b32.xlu1 %v4371_v63, %s4240_s24 }
 0x249   :  { %952 = vrot.lane.b32.xlu1 %v4369_v62, %s4239_s23 }
 0x24d   :  { %771 = vrot.lane.b32.xlu1 %v4371_v63, %s4242_s26 }
 0x251   :  { %769 = vrot.lane.b32.xlu1 %v4371_v63, %s4245_s29 }
 0x255   :  { %1117 = vrot.lane.b32.xlu1 %v4369_v62, %s4241_s25 }
 0x259   :  { %1115 = vrot.lane.b32.xlu1 %v4369_v62, %s4243_s27 }
 0x25d   :  { %1280 = vrot.lane.b32.xlu1 %v4369_v62, %s4238_s22 }
 0x261   :  { %1445 = vrot.lane.b32.xlu1 %v4369_v62, %s4245_s29 }
 0x265   :  { %528 = vrot.lane.b32.xlu1 %v4371_v63, %s4246_s30 }
 0x2ab   :  { %v605_v0 = vpop.permute.xlu0 %604  ;;  %v276_v1 = vpop.permute.xlu1 %275 }
 0x2ac   :  { %3882 = vmatpush3.xpose.msk.msra.mxu0 %vm277_vm4, %v276_v1 }
 0x2ad   :  { %3886 = vmatprep.subr.mxu0 %v4236_v61 }
 0x2af   :  { %v1283_v2 = vpop.permute.xlu0 %1282  ;;  %3884 = vmatmul.mubr.msk.f32.vlgmr.msra.gmra.mxu0 %vm277_vm4, %v4371_v63  ;;  %v442_v3 = vpop.permute.xlu1 %441 }
 0x2b0   :  { %3892 = vmatpush3.xpose.msk.msra.mxu1 %vm277_vm4, %v442_v3  ;;  %3888 = vmatprep.mubr.msk.f32.mxu0 %vm4237_vm3, %v4236_v61 }
 0x2b1   :  { %3901 = vmatprep.subr.mxu1 %v4236_v61 }
 0x2b3   :  { %v1448_v4 = vpop.permute.xlu0 %1447  ;;  %v440_v5 = vpop.permute.xlu1 %439 }
 0x2b4   :  { %3894 = vmatmul.mubr.msk.f32.vlgmr.msra.gmra.mxu1 %vm277_vm4, %v440_v5 }
 0x2b5   :  { %3903 = vmatprep.mubr.msk.f32.mxu1 %vm4237_vm3, %v4236_v61 }
 0x2b7   :  { %v364_v6 = vpop.permute.xlu0 %363  ;;  %v607_v8 = vpop.permute.xlu1 %606 }
 0x2b8   :  { %3887 = vmatpush3.msra.mxu0 %v364_v6  ;;  %3902 = vmatpush3.xpose.msk.msra.mxu1 %vm277_vm4, %v607_v8 }
 0x2b9   :  { %3911 = vmatprep.subr.mxu1 %v4236_v61  ;;  %3896 = vmatprep.subr.mxu0 %v4236_v61 }
 0x2bb   :  { %3904 = vmatmul.mubr.msk.f32.vlgmr.msra.gmra.mxu1 %vm277_vm4, %v605_v0  ;;  %v953_v11 = vpop.permute.xlu1 %952 }
 0x2bc   :  { %3913 = vmatprep.mubr.msk.f32.mxu1 %vm4237_vm3, %v4236_v61 }
 0x2bf   :  { %v772_v13 = vpop.permute.xlu1 %771 }
 0x2c0   :  { %3912 = vmatpush3.xpose.msk.msra.mxu1 %vm277_vm4, %v772_v13 }
 0x2c1   :  { %3921 = vmatprep.subr.mxu1 %v4236_v61 }
 0x2c3   :  { %v770_v14 = vpop.permute.xlu1 %769 }
 0x2c4   :  { %3914 = vmatmul.mubr.msk.f32.vlgmr.msra.gmra.mxu1 %vm277_vm4, %v770_v14 }
 0x2c5   :  { %3922 = vmatpush3.xpose.msk.msra.mxu1 %vm277_vm4, %v953_v11  ;;  %3923 = vmatprep.mubr.msk.f32.mxu1 %vm4237_vm3, %v4236_v61 }
 0x2c6   :  { %3931 = vmatprep.subr.mxu1 %v4236_v61 }
 0x2c7   :  { %v1118_v15 = vpop.permute.xlu1 %1117 }
 0x2c8   :  { %3924 = vmatmul.mubr.msk.f32.vlgmr.msra.gmra.mxu1 %vm277_vm4, %v4369_v62 }
 0x2c9   :  { %3932 = vmatpush3.xpose.msk.msra.mxu1 %vm277_vm4, %v1118_v15  ;;  %3933 = vmatprep.mubr.msk.f32.mxu1 %vm4237_vm3, %v4236_v61 }
 0x2ca   :  { %3941 = vmatprep.subr.mxu1 %v4236_v61 }
 0x2cb   :  { %v1116_v16 = vpop.permute.xlu1 %1115 }
 0x2cc   :  { %3934 = vmatmul.mubr.msk.f32.vlgmr.msra.gmra.mxu1 %vm277_vm4, %v1116_v16 }
 0x2cd   :  { %3942 = vmatpush3.xpose.msk.msra.mxu1 %vm277_vm4, %v1283_v2  ;;  %3943 = vmatprep.mubr.msk.f32.mxu1 %vm4237_vm3, %v4236_v61 }
 0x2ce   :  { %3951 = vmatprep.subr.mxu1 %v4236_v61 }
 0x2cf   :  { %v1281_v17 = vpop.permute.xlu1 %1280 }
 0x2d0   :  { %3944 = vmatmul.mubr.msk.f32.vlgmr.msra.gmra.mxu1 %vm277_vm4, %v1281_v17 }
 0x2d1   :  { %3952 = vmatpush3.xpose.msk.msra.mxu1 %vm277_vm4, %v1448_v4  ;;  %3953 = vmatprep.mubr.msk.f32.mxu1 %vm4237_vm3, %v4236_v61 }
 0x2d3   :  { %v1446_v18 = vpop.permute.xlu1 %1445 }
 0x2d4   :  { %3954 = vmatmul.mubr.msk.f32.vlgmr.msra.gmra.mxu1 %vm277_vm4, %v1446_v18 }
 0x2d7   :  { %v4457_v44 = vpop.permute.xlu1 %528 }
 0x36f   :  { %v348_v19 = vpop.f32.mrf.mxu0 }
 0x370   :  { %v352_v20 = vsel %vm277_vm4, %v348_v19, -inf }
 0x371   :  { %353 = vmax.xlane.f32.xlu0 %v352_v20  ;;  %v3885_v21 = vpop.f32.mrf.mxu0 }
 0x374   :  { %v513_v22 = vpop.f32.mrf.mxu1 }
 0x375   :  { %v517_v23 = vsel %vm277_vm4, %v513_v22, -inf }
 0x376   :  { %518 = vmax.xlane.f32.xlu1 %v517_v23  ;;  %v3895_v24 = vpop.f32.mrf.mxu1 }
 0x37b   :  { %v678_v25 = vpop.f32.mrf.mxu1 }
 0x37c   :  { %v682_v26 = vsel %vm277_vm4, %v678_v25, -inf }
 0x37d   :  { %683 = vmax.xlane.f32.xlu0 %v682_v26  ;;  %v3905_v27 = vpop.f32.mrf.mxu1 }
 0x384   :  { %v843_v28 = vpop.f32.mrf.mxu1 }
 0x385   :  { %v847_v29 = vsel %vm277_vm4, %v843_v28, -inf }
 0x386   :  { %848 = vmax.xlane.f32.xlu0 %v847_v29  ;;  %v3915_v30 = vpop.f32.mrf.mxu1 }
 0x388   :  { %v1024_v31 = vpop.f32.mrf.mxu1 }
 0x389   :  { %v1028_v32 = vsel %vm277_vm4, %v1024_v31, -inf }
 0x38a   :  { %1029 = vmax.xlane.f32.xlu1 %v1028_v32  ;;  %v3925_v33 = vpop.f32.mrf.mxu1 }
 0x38c   :  { %v1189_v34 = vpop.f32.mrf.mxu1 }
 0x38d   :  { %v1193_v35 = vsel %vm277_vm4, %v1189_v34, -inf }
 0x38e   :  { %1194 = vmax.xlane.f32.xlu0 %v1193_v35  ;;  %v3935_v36 = vpop.f32.mrf.mxu1 }
 0x390   :  { %v1354_v37 = vpop.f32.mrf.mxu1 }
 0x391   :  { %v1358_v38 = vsel %vm277_vm4, %v1354_v37, -inf }
 0x392   :  { %1359 = vmax.xlane.f32.xlu1 %v1358_v38  ;;  %v3945_v39 = vpop.f32.mrf.mxu1 }
 0x394   :  { %v1519_v40 = vpop.f32.mrf.mxu1 }
 0x395   :  { %v1523_v41 = vsel %vm277_vm4, %v1519_v40, -inf }
 0x396   :  { %1524 = vmax.xlane.f32.xlu0 %v1523_v41  ;;  %v3955_v42 = vpop.f32.mrf.mxu1 }
 0x3a3   :  { %858 = vrot.lane.b32.xlu1 %v4371_v63, %s4247_s9 }
 0x3ac   :  { %693 = vrot.lane.b32.xlu0 %v4371_v63, %s4248_s10 }
 0x3fa   :  { %v354_v43 = vpop.xlane.xlu0 %353 }
 0x3fb   :  { %v355_v45 = vsub.f32 %v348_v19, %v354_v43 }
 0x3fd   :  { %v356_v46 = vmul.f32 1.442695, %v355_v45 }
 0x3ff   :  { %4138 = vpow2.f32 %v356_v46  ;;  %v519_v49 = vpop.xlane.xlu1 %518 }
 0x400   :  { %v520_v50 = vsub.f32 %v513_v22, %v519_v49 }
 0x402   :  { %v521_v51 = vmul.f32 1.442695, %v520_v50 }
 0x404   :  { %4140 = vpow2.f32 %v521_v51 }
 0x406   :  { %v684_v52 = vpop.xlane.xlu0 %683 }
 0x407   :  { %v685_v53 = vsub.f32 %v678_v25, %v684_v52 }
 0x409   :  { %v686_v54 = vmul.f32 1.442695, %v685_v53 }
 0x40b   :  { %4142 = vpow2.f32 %v686_v54 }
 0x40c   :  { %v4139_v55 = vpop.eup %4138 }
 0x40d   :  { %v358_v56 = vsel %vm277_vm4, %v4139_v55, 0.0 }
 0x40e   :  { %359 = vadd.xlane.f32.xlu1 %v358_v56 }
 0x40f   :  { %v849_v57 = vpop.xlane.xlu0 %848 }
 0x410   :  { %v850_v59 = vsub.f32 %v843_v28, %v849_v57 }
 0x411   :  { %v4141_v63 = vpop.eup %4140 }
 0x412   :  { %v851_v0 = vmul.f32 1.442695, %v850_v59  ;;  %v523_v1 = vsel %vm277_vm4, %v4141_v63, 0.0 }
 0x413   :  { %524 = vadd.xlane.f32.xlu0 %v523_v1  ;;  %v1030_v6 = vpop.xlane.xlu1 %1029 }
 0x414   :  { %4144 = vpow2.f32 %v851_v0  ;;  %v1031_v8 = vsub.f32 %v1024_v31, %v1030_v6 }
 0x416   :  { %v1032_v14 = vmul.f32 1.442695, %v1031_v8 }
 0x417   :  { %v1195_v11 = vpop.xlane.xlu0 %1194 }
 0x418   :  { %v4143_v2 = vpop.eup %4142  ;;  %4146 = vpow2.f32 %v1032_v14  ;;  %v1196_v19 = vsub.f32 %v1189_v34, %v1195_v11 }
 0x419   :  { %v688_v3 = vsel %vm277_vm4, %v4143_v2, 0.0 }
 0x41a   :  { %689 = vadd.xlane.f32.xlu1 %v688_v3  ;;  %v1197_v21 = vmul.f32 1.442695, %v1196_v19 }
 0x41b   :  { %v1360_v13 = vpop.xlane.xlu1 %1359 }
 0x41c   :  { %v1361_v15 = vsub.f32 %v1354_v37, %v1360_v13 }
 0x41e   :  { %v1362_v17 = vmul.f32 1.442695, %v1361_v15 }
 0x41f   :  { %v1525_v16 = vpop.xlane.xlu0 %1524  ;;  %v859_v30 = vpop.permute.xlu1 %858 }
 0x420   :  { %v1526_v18 = vsub.f32 %v1519_v40, %v1525_v16  ;;  %4148 = vpow2.f32 %v1362_v17 }
 0x421   :  { %v4462_v4 = vpop.eup %4144 }
 0x422   :  { %v853_v5 = vsel %vm277_vm4, %v4462_v4, 0.0  ;;  %v1527_v20 = vmul.f32 1.442695, %v1526_v18 }
 0x423   :  { %854 = vadd.xlane.f32.xlu0 %v853_v5  ;;  %v694_v32 = vpop.permute.xlu0 %693 }
 0x424   :  { %4150 = vpow2.f32 %v1527_v20 }
 0x425   :  { %4152 = vpow2.f32 %v1197_v21  ;;  %v4147_v22 = vpop.eup %4146  ;;  %v1642_v21 = vld [vmem:[%s4875_s5 + $0x38] sm:$0xff] }
 0x426   :  { %v1034_v23 = vsel %vm277_vm4, %v4147_v22, 0.0  ;;  %3961 = vmatprep.subr.mxu1 %v1642_v21 }
 0x427   :  { %3962 = vmatpush3.msra.mxu1 %v1642_v21  ;;  %v4588_v21 = vld [vmem:[%s4877_s7 + $0x8] sm:$0x1f] }
 0x42b   :  { %1204 = vrot.lane.b32.xlu1 %v4369_v62, %s4246_s30 }
 0x42d   :  { %v4471_v24 = vpop.eup %4148 }
 0x42e   :  { %v1364_v25 = vsel %vm277_vm4, %v4471_v24, 0.0 }
 0x431   :  { %v4475_v26 = vpop.eup %4150 }
 0x432   :  { %v4153_v27 = vpop.eup %4152  ;;  %v1529_v28 = vsel %vm277_vm4, %v4475_v26, 0.0 }
 0x433   :  { %v1199_v29 = vsel %vm277_vm4, %v4153_v27, 0.0 }
 0x439   :  { %1039 = vrot.lane.b32.xlu0 %v4369_v62, %s4244_s28 }
 0x44f   :  { %1035 = vadd.xlane.f32.xlu1 %v1034_v23  ;;  %v1640_v23 = vld [vmem:[%s4875_s5 + $0x28] sm:$0xff] }
 0x453   :  { %1365 = vadd.xlane.f32.xlu1 %v1364_v25 }
 0x457   :  { %1530 = vadd.xlane.f32.xlu1 %v1529_v28  ;;  %v1637_v28 = vld [vmem:[%s4875_s5 + $0x10] sm:$0xff] }
 0x458   :  { %1200 = vadd.xlane.f32.xlu0 %v1199_v29 }
 0x468   :  { %1534 = vrot.lane.b32.xlu1 %v4369_v62, %s4247_s9 }
 0x46e   :  { %1369 = vrot.lane.b32.xlu0 %v4369_v62, %s4248_s10 }
 0x497   :  { %v360_v31 = vpop.xlane.xlu1 %359 }
 0x498   :  { %4154 = vrcp.f32 %v360_v31 }
 0x49c   :  { %v525_v33 = vpop.xlane.xlu0 %524 }
 0x49d   :  { %4156 = vrcp.f32 %v525_v33 }
 0x4a3   :  { %v690_v34 = vpop.xlane.xlu1 %689 }
 0x4a4   :  { %4158 = vrcp.f32 %v690_v34  ;;  %v1635_v34 = vld [vmem:[%s4875_s5] sm:$0xff] }
 0x4a5   :  { %v4155_v35 = vpop.eup %4154 }
 0x4a6   :  { %v362_v36 = vmul.f32 %v4155_v35, %v4139_v55 }
 0x4a8   :  { %3889 = vmatmul.mubr.msk.f32.vlgmr.msra.gmra.mxu0 %vm277_vm4, %v362_v36 }
 0x4a9   :  { %3897 = vmatpush3.msra.mxu0 %v4457_v44  ;;  %3898 = vmatprep.mubr.msk.f32.mxu0 %vm4237_vm3, %v4236_v61  ;;  %v1205_v44 = vpop.permute.xlu1 %1204 }
 0x4aa   :  { %v4157_v37 = vpop.eup %4156  ;;  %3906 = vmatprep.subr.mxu0 %v4236_v61 }
 0x4ab   :  { %v527_v62 = vmul.f32 %v4157_v37, %v4141_v63 }
 0x4ac   :  { %v855_v38 = vpop.xlane.xlu0 %854 }
 0x4ad   :  { %4160 = vrcp.f32 %v855_v38  ;;  %3899 = vmatmul.mubr.msk.f32.vlgmr.msra.gmra.mxu0 %vm277_vm4, %v527_v62 }
 0x4ae   :  { %3907 = vmatpush3.msra.mxu0 %v694_v32  ;;  %3908 = vmatprep.mubr.msk.f32.mxu0 %vm4237_vm3, %v4236_v61  ;;  %v1636_v32 = vld [vmem:[%s4875_s5 + $0x8] sm:$0xff] }
 0x4af   :  { %3916 = vmatprep.subr.mxu0 %v4236_v61 }
 0x4b0   :  { %v1040_v43 = vpop.permute.xlu0 %1039 }
 0x4b1   :  { %v4159_v39 = vpop.eup %4158 }
 0x4b2   :  { %v692_v40 = vmul.f32 %v4159_v39, %v4143_v2 }
 0x4b4   :  { %3909 = vmatmul.mubr.msk.f32.vlgmr.msra.gmra.mxu0 %vm277_vm4, %v692_v40 }
 0x4b5   :  { %3917 = vmatpush3.msra.mxu0 %v859_v30  ;;  %3918 = vmatprep.mubr.msk.f32.mxu0 %vm4237_vm3, %v4236_v61 }
 0x4b6   :  { %3926 = vmatprep.subr.mxu0 %v4236_v61 }
 0x4ba   :  { %v4161_v41 = vpop.eup %4160 }
 0x4bb   :  { %v857_v42 = vmul.f32 %v4161_v41, %v4462_v4 }
 0x4bd   :  { %3919 = vmatmul.mubr.msk.f32.vlgmr.msra.gmra.mxu0 %vm277_vm4, %v857_v42 }
 0x4be   :  { %3927 = vmatpush3.msra.mxu0 %v1040_v43  ;;  %3928 = vmatprep.mubr.msk.f32.mxu0 %vm4237_vm3, %v4236_v61 }
 0x4bf   :  { %3936 = vmatprep.subr.mxu0 %v4236_v61 }
 0x4d8   :  { %v1036_v45 = vpop.xlane.xlu1 %1035 }
 0x4d9   :  { %4162 = vrcp.f32 %v1036_v45 }
 0x4dc   :  { %v1366_v46 = vpop.xlane.xlu1 %1365 }
 0x4e0   :  { %v1531_v50 = vpop.xlane.xlu1 %1530 }
 0x4e1   :  { %v1201_v49 = vpop.xlane.xlu0 %1200 }
 0x4e2   :  { %4164 = vrcp.f32 %v1201_v49 }
 0x4e3   :  { %4166 = vrcp.f32 %v1366_v46 }
 0x4e4   :  { %4168 = vrcp.f32 %v1531_v50  ;;  %v1535_v63 = vpop.permute.xlu1 %1534 }
 0x4e5   :  { %v1370_v56 = vpop.permute.xlu0 %1369 }
 0x4e6   :  { %v4163_v51 = vpop.eup %4162 }
 0x4e7   :  { %v1038_v52 = vmul.f32 %v4163_v51, %v4147_v22  ;;  %v1641_v22 = vld [vmem:[%s4875_s5 + $0x30] sm:$0xff] }
 0x4e8   :  { %3963 = vmatprep.subr.mxu1 %v1641_v22 }
 0x4e9   :  { %3929 = vmatmul.mubr.msk.f32.vlgmr.msra.gmra.mxu0 %vm277_vm4, %v1038_v52  ;;  %3964 = vmatpush3.msra.mxu1 %v1641_v22 }
 0x4ea   :  { %3937 = vmatpush3.msra.mxu0 %v1205_v44  ;;  %3938 = vmatprep.mubr.msk.f32.mxu0 %vm4237_vm3, %v4236_v61  ;;  %v1645_v44 = vsub.s32 4, %v4316_v7 }
 0x4eb   :  { %3946 = vmatprep.subr.mxu0 %v4236_v61  ;;  %3965 = vmatprep.subr.mxu1 %v1640_v23 }
 0x4ec   :  { %3966 = vmatpush3.msra.mxu1 %v1640_v23  ;;  %v1646_v45 = vrot.slane %v4322_v10, %v1645_v44 }
 0x4ef   :  { %v4165_v53 = vpop.eup %4164 }
 0x4f0   :  { %v1203_v54 = vmul.f32 %v4165_v53, %v4153_v27  ;;  %v4167_v55 = vpop.eup %4166  ;;  %v1638_v27 = vld [vmem:[%s4875_s5 + $0x18] sm:$0xff] }
 0x4f1   :  { %v1368_v57 = vmul.f32 %v4167_v55, %v4471_v24  ;;  %v4169_v59 = vpop.eup %4168  ;;  %v1639_v24 = vld [vmem:[%s4875_s5 + $0x20] sm:$0xff] }
 0x4f2   :  { %3939 = vmatmul.mubr.msk.f32.vlgmr.msra.gmra.mxu0 %vm277_vm4, %v1203_v54  ;;  %v1533_v0 = vmul.f32 %v4169_v59, %v4475_v26  ;;  %3967 = vmatprep.subr.mxu1 %v1639_v24 }
 0x4f3   :  { %3947 = vmatpush3.msra.mxu0 %v1370_v56  ;;  %3948 = vmatprep.mubr.msk.f32.mxu0 %vm4237_vm3, %v4236_v61 }
 0x4f4   :  { %3956 = vmatprep.subr.mxu0 %v4236_v61  ;;  %3968 = vmatpush3.msra.mxu1 %v1639_v24 }
 0x4f5   :  { %3969 = vmatprep.subr.mxu1 %v1638_v27 }
 0x4f6   :  { %3949 = vmatmul.mubr.msk.f32.vlgmr.msra.gmra.mxu0 %vm277_vm4, %v1368_v57  ;;  %3970 = vmatpush3.msra.mxu1 %v1638_v27 }
 0x4f7   :  { %3957 = vmatpush3.msra.mxu0 %v1535_v63  ;;  %3958 = vmatprep.mubr.msk.f32.mxu0 %vm4237_vm3, %v4236_v61 }
 0x4f8   :  { %3971 = vmatprep.subr.mxu1 %v1637_v28 }
 0x4f9   :  { %3972 = vmatpush3.msra.mxu1 %v1637_v28 }
 0x4fa   :  { %3959 = vmatmul.mubr.msk.f32.vlgmr.msra.gmra.mxu0 %vm277_vm4, %v1533_v0  ;;  %3973 = vmatprep.subr.mxu1 %v1636_v32  ;;  %v3715_v0 = vld [vmem:[%s4874_s4 + $0x28] sm:$0xff] }
 0x4fb   :  { %3974 = vmatpush3.msra.mxu1 %v1636_v32 }
 0x4fc   :  { %3975 = vmatprep.subr.mxu1 %v1635_v34 }
 0x4fd   :  { %3976 = vmatpush3.msra.mxu1 %v1635_v34 }
 0x4fe   :  { %4001 = vmatprep.subr.mxu1 %v4236_v61 }
 0x568   :  { %v435_v1 = vpop.f32.mrf.mxu0 }
 0x56a   :  { %v3890_v2 = vpop.f32.mrf.mxu0 }
 0x56d   :  { %v600_v3 = vpop.f32.mrf.mxu0 }
 0x56e   :  { %935 = vrot.lane.b32.xlu0 %v600_v3, %s4249_s11 }
 0x56f   :  { %v3900_v4 = vpop.f32.mrf.mxu0 }
 0x574   :  { %v765_v5 = vpop.f32.mrf.mxu0 }
 0x575   :  { %939 = vrot.lane.b32.xlu1 %v765_v5, %s4250_s12 }
 0x576   :  { %v3910_v6 = vpop.f32.mrf.mxu0 }
 0x57d   :  { %v930_v8 = vpop.f32.mrf.mxu0 }
 0x57e   :  { %943 = vrot.lane.b32.xlu1 %v930_v8, %s4251_s3 }
 0x57f   :  { %v3920_v11 = vpop.f32.mrf.mxu0 }
 0x5a9   :  { %v1111_v13 = vpop.f32.mrf.mxu0 }
 0x5ab   :  { %v3930_v14 = vpop.f32.mrf.mxu0 }
 0x5b2   :  { %v1276_v15 = vpop.f32.mrf.mxu0 }
 0x5b3   :  { %1611 = vrot.lane.b32.xlu0 %v1276_v15, %s4249_s11 }
 0x5b4   :  { %v3940_v16 = vpop.f32.mrf.mxu0 }
 0x5b6   :  { %v1441_v17 = vpop.f32.mrf.mxu0 }
 0x5b7   :  { %1615 = vrot.lane.b32.xlu0 %v1441_v17, %s4250_s12 }
 0x5b8   :  { %v3950_v18 = vpop.f32.mrf.mxu0 }
 0x5ba   :  { %v1606_v19 = vpop.f32.mrf.mxu0 }
 0x5bb   :  { %1619 = vrot.lane.b32.xlu1 %v1606_v19, %s4251_s3 }
 0x5bc   :  { %v3960_v20 = vpop.f32.mrf.mxu0 }
 0x5bd   :  { %v1763_v20 = vsub.s32 6, %v4316_v7 }
 0x5bf   :  { %v1764_v23 = vrot.slane %v4322_v10, %v1763_v20 }
 0x5e0   :  { %v936_v25 = vpop.permute.xlu0 %935 }
 0x5e1   :  { %v946_v29 = vsel %vm277_vm4, %v435_v1, %v936_v25  ;;  %v3714_v1 = vld [vmem:[%s4874_s4 + $0x20] sm:$0xff]  ;;  %v1770_v25 = vrot.slane %v4588_v21, %v49_v9 }
 0x5e7   :  { %v940_v26 = vpop.permute.xlu1 %939 }
 0x5e8   :  { %v948_v30 = vsel %vm947_vm5, %v946_v29, %v940_v26 }
 0x5f0   :  { %v944_v31 = vpop.permute.xlu1 %943 }
 0x5f1   :  { %v950_v33 = vsel %vm949_vm6, %v948_v30, %v944_v31 }
 0x5f2   :  { %1627 = vrot.lane.b32.xlu0 %v950_v33, %s4252_s1 }
 0x625   :  { %v1612_v35 = vpop.permute.xlu0 %1611 }
 0x626   :  { %v1622_v37 = vsel %vm277_vm4, %v1111_v13, %v1612_v35 }
 0x629   :  { %v1616_v36 = vpop.permute.xlu0 %1615 }
 0x62a   :  { %v1623_v62 = vsel %vm947_vm5, %v1622_v37, %v1616_v36 }
 0x62d   :  { %v1620_v38 = vpop.permute.xlu1 %1619 }
 0x62e   :  { %v1624_v39 = vsel %vm949_vm6, %v1623_v62, %v1620_v38 }
 0x62f   :  { %1629 = vrot.lane.b32.xlu1 %v1624_v39, %s4252_s1 }
 0x664   :  { %v1628_v40 = vpop.permute.xlu0 %1627 }
 0x665   :  { %v1633_v41 = vsel %vm145_vm2, %v4355_v58, %v1628_v40 }
 0x666   :  { %3977 = vmatprep.mubr.msk.f32.mxu1 %vm1647_vm7, %v1633_v41 }
 0x6a1   :  { %v1630_v42 = vpop.permute.xlu1 %1629 }
 0x6a2   :  { %v1634_v43 = vsel %vm145_vm2, %v4359_v60, %v1630_v42 }
 0x6a3   :  { %3978 = vmatmul.mubr.msk.f32.vlgmr.msra.gmra.mxu1 %vm1647_vm7, %v1634_v43 }
 0x6a4   :  { %4003 = vmatprep.mubr.msk.f32.mxu1 %vm4237_vm3, %v4236_v61 }
 0x763   :  { %v3979_v46 = vpop.f32.mrf.mxu1 }
 0x764   :  { %v1726_v49 = vadd.f32 %v3979_v46, %v1646_v45 }
 0x765   :  { %v1720_v50 = vpop.f32.mrf.mxu1 }
 0x766   :  { %v1730_v51 = vadd.f32 %v1726_v49, %v4359_v60  ;;  %v1721_v52 = vadd.f32 %v1720_v50, %v1646_v45  ;;  %v3717_v60 = vld [vmem:[%s4874_s4 + $0x38] sm:$0xff] }
 0x767   :  { %3980 = vmatprep.subr.mxu0 %v3717_v60 }
 0x768   :  { %v1729_v53 = vadd.f32 %v1721_v52, %v4355_v58  ;;  %v1734_v54 = vsel %vm145_vm2, %v1730_v51, 0.0  ;;  %v1740_v59 = vmul.f32 %v1730_v51, %v1730_v51  ;;  %v3716_v58 = vld [vmem:[%s4874_s4 + $0x30] sm:$0xff]  ;;  %3981 = vmatpush3.msra.mxu0 %v3717_v60 }
 0x769   :  { %1735 = vadd.xlane.f32.xlu1 %v1734_v54  ;;  %3982 = vmatprep.subr.mxu0 %v3716_v58 }
 0x76a   :  { %v1731_v55 = vsel %vm145_vm2, %v1729_v53, 0.0  ;;  %v1739_v56 = vmul.f32 %v1729_v53, %v1729_v53  ;;  %v1744_v63 = vsel %vm145_vm2, %v1740_v59, 0.0  ;;  %3983 = vmatpush3.msra.mxu0 %v3716_v58 }
 0x76b   :  { %1732 = vadd.xlane.f32.xlu0 %v1731_v55  ;;  %3984 = vmatprep.subr.mxu0 %v3715_v0 }
 0x76c   :  { %v1741_v57 = vsel %vm145_vm2, %v1739_v56, 0.0  ;;  %3985 = vmatpush3.msra.mxu0 %v3715_v0 }
 0x76d   :  { %3986 = vmatprep.subr.mxu0 %v3714_v1 }
 0x76e   :  { %3987 = vmatpush3.msra.mxu0 %v3714_v1 }
 0x76f   :  { %1742 = vadd.xlane.f32.xlu0 %v1741_v57  ;;  %3991 = vmatprep.subr.mxu0 %v4236_v61 }
 0x773   :  { %1745 = vadd.xlane.f32.xlu0 %v1744_v63 }
 0x7f2   :  { %v1736_v4 = vpop.xlane.xlu1 %1735 }
 0x7f3   :  { %v1738_v6 = vmul.f32 0.03125, %v1736_v4 }
 0x7f4   :  { %v1733_v2 = vpop.xlane.xlu0 %1732 }
 0x7f5   :  { %v1737_v3 = vmul.f32 0.03125, %v1733_v2  ;;  %v1752_v15 = vmul.f32 %v1738_v6, %v1738_v6  ;;  %v1750_v27 = vsub.f32 %v1730_v51, %v1738_v6 }
 0x7f7   :  { %v1751_v8 = vmul.f32 %v1737_v3, %v1737_v3  ;;  %v1749_v22 = vsub.f32 %v1729_v53, %v1737_v3 }
 0x7f8   :  { %v1743_v5 = vpop.xlane.xlu0 %1742 }
 0x7f9   :  { %v1747_v11 = vmul.f32 0.03125, %v1743_v5 }
 0x7fb   :  { %v1753_v13 = vsub.f32 %v1747_v11, %v1751_v8 }
 0x7fc   :  { %v1746_v14 = vpop.xlane.xlu0 %1745 }
 0x7fd   :  { %v1755_v16 = vadd.f32 1e-05, %v1753_v13  ;;  %v1748_v17 = vmul.f32 0.03125, %v1746_v14 }
 0x7ff   :  { %4170 = vrsqrt.f32 %v1755_v16  ;;  %v1754_v18 = vsub.f32 %v1748_v17, %v1752_v15 }
 0x801   :  { %v1756_v19 = vadd.f32 1e-05, %v1754_v18 }
 0x803   :  { %4172 = vrsqrt.f32 %v1756_v19 }
 0x80c   :  { %v4171_v24 = vpop.eup %4170 }
 0x80d   :  { %v1759_v26 = vmul.f32 %v4171_v24, %v1749_v22 }
 0x80f   :  { %v1765_v28 = vmul.f32 %v1764_v23, %v1759_v26 }
 0x810   :  { %v4173_v29 = vpop.eup %4172 }
 0x811   :  { %v1760_v30 = vmul.f32 %v4173_v29, %v1750_v27  ;;  %v4594_v31 = vadd.f32 %v1770_v25, %v1765_v28 }
 0x813   :  { %v1766_v32 = vmul.f32 %v1764_v23, %v1760_v30  ;;  %3988 = vmatprep.mubr.msk.f32.mxu0 %vm145_vm2, %v4594_v31 }
 0x815   :  { %v4598_v33 = vadd.f32 %v1770_v25, %v1766_v32 }
 0x817   :  { %3989 = vmatmul.mubr.msk.f32.vlgmr.msra.gmra.mxu0 %vm145_vm2, %v4598_v33 }
 0x818   :  { %3993 = vmatprep.mubr.msk.f32.mxu0 %vm4237_vm3, %v4236_v61 }
 0x8d7   :  { %v4604_v9 = vpop.f32.mrf.mxu0 }
 0x8d9   :  { %v4606_v10 = vpop.f32.mrf.mxu0 }
 0x8da   :  { %2025 = vrot.lane.b32.xlu0 %v4606_v10, %s4241_s25  ;;  %1860 = vrot.lane.b32.xlu1 %v4606_v10, %s4239_s23 }
 0x8de   :  { %2188 = vrot.lane.b32.xlu0 %v4606_v10, %s4238_s22  ;;  %2023 = vrot.lane.b32.xlu1 %v4606_v10, %s4243_s27 }
 0x8e2   :  { %2353 = vrot.lane.b32.xlu0 %v4606_v10, %s4245_s29  ;;  %2190 = vrot.lane.b32.xlu1 %v4606_v10, %s4240_s24 }
 0x8e6   :  { %2699 = vrot.lane.b32.xlu0 %v4604_v9, %s4241_s25  ;;  %2355 = vrot.lane.b32.xlu1 %v4606_v10, %s4242_s26 }
 0x8ea   :  { %2864 = vrot.lane.b32.xlu0 %v4604_v9, %s4240_s24  ;;  %2534 = vrot.lane.b32.xlu1 %v4604_v9, %s4239_s23 }
 0x8ee   :  { %3029 = vrot.lane.b32.xlu0 %v4604_v9, %s4242_s26  ;;  %2697 = vrot.lane.b32.xlu1 %v4604_v9, %s4243_s27 }
 0x8f2   :  { %1947 = vrot.lane.b32.xlu0 %v4606_v10, %s4244_s28  ;;  %2862 = vrot.lane.b32.xlu1 %v4604_v9, %s4238_s22 }
 0x8f6   :  { %3027 = vrot.lane.b32.xlu1 %v4604_v9, %s4245_s29 }
 0x8fa   :  { %2112 = vrot.lane.b32.xlu1 %v4606_v10, %s4246_s30 }
 0x94c   :  { %v2026_v34 = vpop.permute.xlu0 %2025  ;;  %v1861_v35 = vpop.permute.xlu1 %1860 }
 0x94d   :  { %3992 = vmatpush3.xpose.msk.msra.mxu0 %vm277_vm4, %v1861_v35  ;;  %4002 = vmatpush3.xpose.msk.msra.mxu1 %vm277_vm4, %v2026_v34 }
 0x94e   :  { %4011 = vmatprep.subr.mxu1 %v4236_v61  ;;  %3996 = vmatprep.subr.mxu0 %v4236_v61 }
 0x950   :  { %v2189_v36 = vpop.permute.xlu0 %2188  ;;  %3994 = vmatmul.mubr.msk.f32.vlgmr.msra.gmra.mxu0 %vm277_vm4, %v4606_v10  ;;  %v2024_v37 = vpop.permute.xlu1 %2023 }
 0x951   :  { %4004 = vmatmul.mubr.msk.f32.vlgmr.msra.gmra.mxu1 %vm277_vm4, %v2024_v37  ;;  %3998 = vmatprep.mubr.msk.f32.mxu0 %vm4237_vm3, %v4236_v61 }
 0x952   :  { %4013 = vmatprep.mubr.msk.f32.mxu1 %vm4237_vm3, %v4236_v61 }
 0x954   :  { %v2354_v62 = vpop.permute.xlu0 %2353  ;;  %v2191_v38 = vpop.permute.xlu1 %2190 }
 0x955   :  { %4012 = vmatpush3.xpose.msk.msra.mxu1 %vm277_vm4, %v2191_v38 }
 0x956   :  { %4021 = vmatprep.subr.mxu1 %v4236_v61 }
 0x958   :  { %v2700_v39 = vpop.permute.xlu0 %2699  ;;  %4014 = vmatmul.mubr.msk.f32.vlgmr.msra.gmra.mxu1 %vm277_vm4, %v2189_v36  ;;  %v2356_v40 = vpop.permute.xlu1 %2355 }
 0x959   :  { %4022 = vmatpush3.xpose.msk.msra.mxu1 %vm277_vm4, %v2356_v40  ;;  %4023 = vmatprep.mubr.msk.f32.mxu1 %vm4237_vm3, %v4236_v61 }
 0x95a   :  { %4031 = vmatprep.subr.mxu1 %v4236_v61 }
 0x95c   :  { %v2865_v41 = vpop.permute.xlu0 %2864  ;;  %4024 = vmatmul.mubr.msk.f32.vlgmr.msra.gmra.mxu1 %vm277_vm4, %v2354_v62  ;;  %v2535_v42 = vpop.permute.xlu1 %2534 }
 0x95d   :  { %4032 = vmatpush3.xpose.msk.msra.mxu1 %vm277_vm4, %v2535_v42  ;;  %4033 = vmatprep.mubr.msk.f32.mxu1 %vm4237_vm3, %v4236_v61 }
 0x95e   :  { %4041 = vmatprep.subr.mxu1 %v4236_v61 }
 0x960   :  { %v3030_v43 = vpop.permute.xlu0 %3029  ;;  %4034 = vmatmul.mubr.msk.f32.vlgmr.msra.gmra.mxu1 %vm277_vm4, %v4604_v9  ;;  %v2698_v44 = vpop.permute.xlu1 %2697 }
 0x961   :  { %4042 = vmatpush3.xpose.msk.msra.mxu1 %vm277_vm4, %v2700_v39  ;;  %4043 = vmatprep.mubr.msk.f32.mxu1 %vm4237_vm3, %v4236_v61 }
 0x962   :  { %4051 = vmatprep.subr.mxu1 %v4236_v61 }
 0x964   :  { %v1948_v45 = vpop.permute.xlu0 %1947  ;;  %4044 = vmatmul.mubr.msk.f32.vlgmr.msra.gmra.mxu1 %vm277_vm4, %v2698_v44  ;;  %v2863_v46 = vpop.permute.xlu1 %2862 }
 0x965   :  { %3997 = vmatpush3.msra.mxu0 %v1948_v45  ;;  %4052 = vmatpush3.xpose.msk.msra.mxu1 %vm277_vm4, %v2865_v41 }
 0x966   :  { %4053 = vmatprep.mubr.msk.f32.mxu1 %vm4237_vm3, %v4236_v61  ;;  %4061 = vmatprep.subr.mxu1 %v4236_v61 }
 0x967   :  { %4006 = vmatprep.subr.mxu0 %v4236_v61 }
 0x968   :  { %4054 = vmatmul.mubr.msk.f32.vlgmr.msra.gmra.mxu1 %vm277_vm4, %v2863_v46  ;;  %v3028_v49 = vpop.permute.xlu1 %3027 }
 0x969   :  { %4062 = vmatpush3.xpose.msk.msra.mxu1 %vm277_vm4, %v3030_v43  ;;  %4063 = vmatprep.mubr.msk.f32.mxu1 %vm4237_vm3, %v4236_v61 }
 0x96c   :  { %4064 = vmatmul.mubr.msk.f32.vlgmr.msra.gmra.mxu1 %vm277_vm4, %v3028_v49  ;;  %v4692_v16 = vpop.permute.xlu1 %2112 }
 0xa10   :  { %v1932_v50 = vpop.f32.mrf.mxu0 }
 0xa11   :  { %v2097_v51 = vpop.f32.mrf.mxu1  ;;  %v1936_v52 = vsel %vm277_vm4, %v1932_v50, -inf }
 0xa12   :  { %1937 = vmax.xlane.f32.xlu0 %v1936_v52  ;;  %v3995_v53 = vpop.f32.mrf.mxu0  ;;  %v2101_v54 = vsel %vm277_vm4, %v2097_v51, -inf }
 0xa13   :  { %2102 = vmax.xlane.f32.xlu1 %v2101_v54  ;;  %v4005_v55 = vpop.f32.mrf.mxu1 }
 0xa18   :  { %v2262_v56 = vpop.f32.mrf.mxu1 }
 0xa19   :  { %v2266_v57 = vsel %vm277_vm4, %v2262_v56, -inf }
 0xa1a   :  { %2267 = vmax.xlane.f32.xlu0 %v2266_v57  ;;  %v4015_v59 = vpop.f32.mrf.mxu1 }
 0xa1c   :  { %v2427_v63 = vpop.f32.mrf.mxu1 }
 0xa1d   :  { %v2431_v60 = vsel %vm277_vm4, %v2427_v63, -inf }
 0xa1e   :  { %2432 = vmax.xlane.f32.xlu0 %v2431_v60  ;;  %v4025_v58 = vpop.f32.mrf.mxu1 }
 0xa20   :  { %v2606_v0 = vpop.f32.mrf.mxu1 }
 0xa21   :  { %v2610_v1 = vsel %vm277_vm4, %v2606_v0, -inf }
 0xa22   :  { %2611 = vmax.xlane.f32.xlu1 %v2610_v1  ;;  %v4035_v2 = vpop.f32.mrf.mxu1 }
 0xa24   :  { %v2771_v3 = vpop.f32.mrf.mxu1 }
 0xa25   :  { %v2775_v4 = vsel %vm277_vm4, %v2771_v3, -inf }
 0xa26   :  { %2776 = vmax.xlane.f32.xlu0 %v2775_v4  ;;  %v4045_v5 = vpop.f32.mrf.mxu1 }
 0xa28   :  { %v2936_v6 = vpop.f32.mrf.mxu1 }
 0xa29   :  { %v2940_v8 = vsel %vm277_vm4, %v2936_v6, -inf }
 0xa2a   :  { %2941 = vmax.xlane.f32.xlu1 %v2940_v8  ;;  %v4055_v11 = vpop.f32.mrf.mxu1 }
 0xa2c   :  { %v3101_v13 = vpop.f32.mrf.mxu1 }
 0xa2d   :  { %v3105_v14 = vsel %vm277_vm4, %v3101_v13, -inf }
 0xa2e   :  { %3106 = vmax.xlane.f32.xlu0 %v3105_v14  ;;  %v4065_v15 = vpop.f32.mrf.mxu1 }
 0xa3b   :  { %2442 = vrot.lane.b32.xlu1 %v4606_v10, %s4247_s9 }
 0xa44   :  { %2277 = vrot.lane.b32.xlu0 %v4606_v10, %s4248_s10 }
 0xa9b   :  { %v1938_v17 = vpop.xlane.xlu0 %1937 }
 0xa9c   :  { %v1939_v18 = vsub.f32 %v1932_v50, %v1938_v17  ;;  %v2103_v19 = vpop.xlane.xlu1 %2102 }
 0xa9d   :  { %v2104_v20 = vsub.f32 %v2097_v51, %v2103_v19 }
 0xa9e   :  { %v1940_v22 = vmul.f32 1.442695, %v1939_v18 }
 0xa9f   :  { %v2105_v23 = vmul.f32 1.442695, %v2104_v20 }
 0xaa0   :  { %4174 = vpow2.f32 %v1940_v22 }
 0xaa1   :  { %4176 = vpow2.f32 %v2105_v23 }
 0xaa3   :  { %v2268_v24 = vpop.xlane.xlu0 %2267 }
 0xaa4   :  { %v2269_v25 = vsub.f32 %v2262_v56, %v2268_v24 }
 0xaa6   :  { %v2270_v26 = vmul.f32 1.442695, %v2269_v25 }
 0xaa7   :  { %v2433_v27 = vpop.xlane.xlu0 %2432 }
 0xaa8   :  { %4178 = vpow2.f32 %v2270_v26  ;;  %v2434_v28 = vsub.f32 %v2427_v63, %v2433_v27 }
 0xaaa   :  { %v2435_v29 = vmul.f32 1.442695, %v2434_v28 }
 0xaab   :  { %v2612_v38 = vpop.xlane.xlu1 %2611 }
 0xaac   :  { %4180 = vpow2.f32 %v2435_v29  ;;  %v2613_v39 = vsub.f32 %v2606_v0, %v2612_v38 }
 0xaad   :  { %v4175_v30 = vpop.eup %4174 }
 0xaae   :  { %v4177_v32 = vpop.eup %4176  ;;  %v1942_v10 = vsel %vm277_vm4, %v4175_v30, 0.0  ;;  %v2614_v43 = vmul.f32 1.442695, %v2613_v39 }
 0xaaf   :  { %1943 = vadd.xlane.f32.xlu1 %v1942_v10  ;;  %v2107_v34 = vsel %vm277_vm4, %v4177_v32, 0.0  ;;  %v2777_v40 = vpop.xlane.xlu0 %2776 }
 0xab0   :  { %2108 = vadd.xlane.f32.xlu0 %v2107_v34  ;;  %v2778_v42 = vsub.f32 %v2771_v3, %v2777_v40  ;;  %4182 = vpow2.f32 %v2614_v43 }
 0xab2   :  { %v2779_v46 = vmul.f32 1.442695, %v2778_v42 }
 0xab3   :  { %v2942_v41 = vpop.xlane.xlu1 %2941 }
 0xab4   :  { %v2943_v44 = vsub.f32 %v2936_v6, %v2942_v41  ;;  %4184 = vpow2.f32 %v2779_v46 }
 0xab5   :  { %v4179_v35 = vpop.eup %4178 }
 0xab6   :  { %v2272_v36 = vsel %vm277_vm4, %v4179_v35, 0.0  ;;  %v2944_v49 = vmul.f32 1.442695, %v2943_v44 }
 0xab7   :  { %2273 = vadd.xlane.f32.xlu1 %v2272_v36  ;;  %v3107_v45 = vpop.xlane.xlu0 %3106  ;;  %v2443_v60 = vpop.permute.xlu1 %2442 }
 0xab8   :  { %v3108_v50 = vsub.f32 %v3101_v13, %v3107_v45  ;;  %4186 = vpow2.f32 %v2944_v49 }
 0xab9   :  { %v4697_v37 = vpop.eup %4180 }
 0xaba   :  { %v2437_v62 = vsel %vm277_vm4, %v4697_v37, 0.0  ;;  %v3109_v51 = vmul.f32 1.442695, %v3108_v50  ;;  %v3751_v50 = vld [vmem:[%s4875_s5 + $0x78] sm:$0xff] }
 0xabb   :  { %2438 = vadd.xlane.f32.xlu0 %v2437_v62  ;;  %v2278_v58 = vpop.permute.xlu0 %2277  ;;  %4071 = vmatprep.subr.mxu1 %v3751_v50 }
 0xabc   :  { %4188 = vpow2.f32 %v3109_v51  ;;  %v3750_v51 = vld [vmem:[%s4875_s5 + $0x70] sm:$0xff]  ;;  %4072 = vmatpush3.msra.mxu1 %v3751_v50 }
 0xabd   :  { %v4183_v52 = vpop.eup %4182  ;;  %4073 = vmatprep.subr.mxu1 %v3750_v51 }
 0xabe   :  { %v2616_v54 = vsel %vm277_vm4, %v4183_v52, 0.0  ;;  %4074 = vmatpush3.msra.mxu1 %v3750_v51 }
 0xac1   :  { %v4705_v53 = vpop.eup %4184 }
 0xac2   :  { %v2781_v56 = vsel %vm277_vm4, %v4705_v53, 0.0 }
 0xac5   :  { %v4708_v55 = vpop.eup %4186 }
 0xac6   :  { %v2946_v57 = vsel %vm277_vm4, %v4708_v55, 0.0 }
 0xac8   :  { %2786 = vrot.lane.b32.xlu1 %v4604_v9, %s4246_s30 }
 0xac9   :  { %v4714_v59 = vpop.eup %4188 }
 0xaca   :  { %v3111_v63 = vsel %vm277_vm4, %v4714_v59, 0.0 }
 0xad1   :  { %2621 = vrot.lane.b32.xlu0 %v4604_v9, %s4244_s28 }
 0xaec   :  { %2617 = vadd.xlane.f32.xlu1 %v2616_v54 }
 0xaf0   :  { %2782 = vadd.xlane.f32.xlu0 %v2781_v56  ;;  %2947 = vadd.xlane.f32.xlu1 %v2946_v57  ;;  %v3747_v56 = vld [vmem:[%s4875_s5 + $0x58] sm:$0xff]  ;;  %v3746_v57 = vld [vmem:[%s4875_s5 + $0x50] sm:$0xff] }
 0xaf4   :  { %3112 = vadd.xlane.f32.xlu1 %v3111_v63 }
 0xb05   :  { %3116 = vrot.lane.b32.xlu1 %v4604_v9, %s4247_s9 }
 0xb06   :  { %2951 = vrot.lane.b32.xlu0 %v4604_v9, %s4248_s10 }
 0xb38   :  { %v1944_v0 = vpop.xlane.xlu1 %1943 }
 0xb39   :  { %4190 = vrcp.f32 %v1944_v0  ;;  %v2109_v1 = vpop.xlane.xlu0 %2108 }
 0xb3a   :  { %4192 = vrcp.f32 %v2109_v1  ;;  %v3744_v1 = vld [vmem:[%s4875_s5 + $0x40] sm:$0xff] }
 0xb40   :  { %v2274_v2 = vpop.xlane.xlu1 %2273 }
 0xb41   :  { %4194 = vrcp.f32 %v2274_v2 }
 0xb44   :  { %v2439_v3 = vpop.xlane.xlu0 %2438 }
 0xb45   :  { %4196 = vrcp.f32 %v2439_v3 }
 0xb46   :  { %v4191_v4 = vpop.eup %4190 }
 0xb47   :  { %v1946_v5 = vmul.f32 %v4191_v4, %v4175_v30  ;;  %v4193_v6 = vpop.eup %4192 }
 0xb48   :  { %v2111_v9 = vmul.f32 %v4193_v6, %v4177_v32  ;;  %v2622_v15 = vpop.permute.xlu0 %2621 }
 0xb49   :  { %3999 = vmatmul.mubr.msk.f32.vlgmr.msra.gmra.mxu0 %vm277_vm4, %v1946_v5 }
 0xb4a   :  { %4007 = vmatpush3.msra.mxu0 %v4692_v16  ;;  %4008 = vmatprep.mubr.msk.f32.mxu0 %vm4237_vm3, %v4236_v61  ;;  %v2787_v16 = vpop.permute.xlu1 %2786 }
 0xb4b   :  { %4016 = vmatprep.subr.mxu0 %v4236_v61 }
 0xb4d   :  { %4009 = vmatmul.mubr.msk.f32.vlgmr.msra.gmra.mxu0 %vm277_vm4, %v2111_v9 }
 0xb4e   :  { %v4195_v8 = vpop.eup %4194  ;;  %4017 = vmatpush3.msra.mxu0 %v2278_v58  ;;  %4018 = vmatprep.mubr.msk.f32.mxu0 %vm4237_vm3, %v4236_v61  ;;  %v3745_v58 = vld [vmem:[%s4875_s5 + $0x48] sm:$0xff] }
 0xb4f   :  { %4026 = vmatprep.subr.mxu0 %v4236_v61  ;;  %v2276_v11 = vmul.f32 %v4195_v8, %v4179_v35 }
 0xb51   :  { %4019 = vmatmul.mubr.msk.f32.vlgmr.msra.gmra.mxu0 %vm277_vm4, %v2276_v11 }
 0xb52   :  { %v4197_v13 = vpop.eup %4196  ;;  %4027 = vmatpush3.msra.mxu0 %v2443_v60  ;;  %4028 = vmatprep.mubr.msk.f32.mxu0 %vm4237_vm3, %v4236_v61 }
 0xb53   :  { %4036 = vmatprep.subr.mxu0 %v4236_v61  ;;  %v2441_v14 = vmul.f32 %v4197_v13, %v4697_v37 }
 0xb55   :  { %4029 = vmatmul.mubr.msk.f32.vlgmr.msra.gmra.mxu0 %vm277_vm4, %v2441_v14 }
 0xb56   :  { %4037 = vmatpush3.msra.mxu0 %v2622_v15  ;;  %4038 = vmatprep.mubr.msk.f32.mxu0 %vm4237_vm3, %v4236_v61  ;;  %v3228_v15 = vsub.s32 5, %v4316_v7 }
 0xb57   :  { %4046 = vmatprep.subr.mxu0 %v4236_v61 }
 0xb75   :  { %v2618_v17 = vpop.xlane.xlu1 %2617 }
 0xb76   :  { %4198 = vrcp.f32 %v2618_v17 }
 0xb79   :  { %v2783_v18 = vpop.xlane.xlu0 %2782  ;;  %v2948_v19 = vpop.xlane.xlu1 %2947 }
 0xb7a   :  { %4200 = vrcp.f32 %v2783_v18 }
 0xb7b   :  { %4202 = vrcp.f32 %v2948_v19 }
 0xb7d   :  { %v3113_v20 = vpop.xlane.xlu1 %3112  ;;  %v2952_v27 = vpop.permute.xlu0 %2951 }
 0xb7e   :  { %4204 = vrcp.f32 %v3113_v20 }
 0xb81   :  { %v3117_v30 = vpop.permute.xlu1 %3116 }
 0xb83   :  { %v4199_v22 = vpop.eup %4198 }
 0xb84   :  { %v2620_v23 = vmul.f32 %v4199_v22, %v4183_v52  ;;  %v3749_v52 = vld [vmem:[%s4875_s5 + $0x68] sm:$0xff] }
 0xb85   :  { %4075 = vmatprep.subr.mxu1 %v3749_v52 }
 0xb86   :  { %4039 = vmatmul.mubr.msk.f32.vlgmr.msra.gmra.mxu0 %vm277_vm4, %v2620_v23  ;;  %4076 = vmatpush3.msra.mxu1 %v3749_v52 }
 0xb87   :  { %v4201_v24 = vpop.eup %4200  ;;  %4047 = vmatpush3.msra.mxu0 %v2787_v16  ;;  %4048 = vmatprep.mubr.msk.f32.mxu0 %vm4237_vm3, %v4236_v61  ;;  %v4212_v16 = vld [vmem:[%s4877_s7] sm:$0xff] }
 0xb88   :  { %4056 = vmatprep.subr.mxu0 %v4236_v61  ;;  %v2785_v25 = vmul.f32 %v4201_v24, %v4705_v53  ;;  %v4203_v26 = vpop.eup %4202  ;;  %v3748_v53 = vld [vmem:[%s4875_s5 + $0x60] sm:$0xff]  ;;  %v3229_v17 = vrot.slane %v4212_v16, %v3228_v15 }
 0xb89   :  { %v2950_v28 = vmul.f32 %v4203_v26, %v4708_v55  ;;  %4077 = vmatprep.subr.mxu1 %v3748_v53 }
 0xb8a   :  { %4049 = vmatmul.mubr.msk.f32.vlgmr.msra.gmra.mxu0 %vm277_vm4, %v2785_v25  ;;  %4078 = vmatpush3.msra.mxu1 %v3748_v53  ;;  %v3352_v53 = vrot.slane %v4588_v21, %v141_v12 }
 0xb8b   :  { %4057 = vmatpush3.msra.mxu0 %v2952_v27  ;;  %4058 = vmatprep.mubr.msk.f32.mxu0 %vm4237_vm3, %v4236_v61  ;;  %v4205_v29 = vpop.eup %4204 }
 0xb8c   :  { %4066 = vmatprep.subr.mxu0 %v4236_v61  ;;  %v3115_v32 = vmul.f32 %v4205_v29, %v4714_v59  ;;  %4079 = vmatprep.subr.mxu1 %v3747_v56 }
 0xb8d   :  { %4080 = vmatpush3.msra.mxu1 %v3747_v56 }
 0xb8e   :  { %4059 = vmatmul.mubr.msk.f32.vlgmr.msra.gmra.mxu0 %vm277_vm4, %v2950_v28  ;;  %4081 = vmatprep.subr.mxu1 %v3746_v57 }
 0xb8f   :  { %4067 = vmatpush3.msra.mxu0 %v3117_v30  ;;  %4068 = vmatprep.mubr.msk.f32.mxu0 %vm4237_vm3, %v4236_v61 }
 0xb90   :  { %4090 = vmatprep.subr.mxu0 %v4236_v61  ;;  %4082 = vmatpush3.msra.mxu1 %v3746_v57 }
 0xb91   :  { %4083 = vmatprep.subr.mxu1 %v3745_v58 }
 0xb92   :  { %4069 = vmatmul.mubr.msk.f32.vlgmr.msra.gmra.mxu0 %vm277_vm4, %v3115_v32  ;;  %4084 = vmatpush3.msra.mxu1 %v3745_v58  ;;  %v3375_v32 = vld [vmem:[%s4876_s6 + $0x8] sm:$0xff] }
 0xb93   :  { %4098 = vmatprep.mubr.msk.f32.mxu0 %vm4237_vm3, %v4236_v61  ;;  %4085 = vmatprep.subr.mxu1 %v3744_v1 }
 0xb94   :  { %4086 = vmatpush3.msra.mxu1 %v3744_v1 }
 0xc09   :  { %v2019_v10 = vpop.f32.mrf.mxu0 }
 0xc0b   :  { %v4000_v34 = vpop.f32.mrf.mxu0 }
 0xc0d   :  { %v2184_v35 = vpop.f32.mrf.mxu0 }
 0xc0e   :  { %2519 = vrot.lane.b32.xlu0 %v2184_v35, %s4249_s11 }
 0xc0f   :  { %v4010_v36 = vpop.f32.mrf.mxu0 }
 0xc11   :  { %v2349_v37 = vpop.f32.mrf.mxu0 }
 0xc12   :  { %2523 = vrot.lane.b32.xlu1 %v2349_v37, %s4250_s12 }
 0xc13   :  { %v4020_v62 = vpop.f32.mrf.mxu0 }
 0xc15   :  { %v2514_v38 = vpop.f32.mrf.mxu0 }
 0xc16   :  { %2527 = vrot.lane.b32.xlu1 %v2514_v38, %s4251_s3 }
 0xc17   :  { %v4030_v39 = vpop.f32.mrf.mxu0 }
 0xc46   :  { %v2693_v40 = vpop.f32.mrf.mxu0 }
 0xc48   :  { %v4040_v41 = vpop.f32.mrf.mxu0 }
 0xc4a   :  { %v2858_v42 = vpop.f32.mrf.mxu0 }
 0xc4b   :  { %3193 = vrot.lane.b32.xlu0 %v2858_v42, %s4249_s11 }
 0xc4c   :  { %v4050_v43 = vpop.f32.mrf.mxu0 }
 0xc4e   :  { %v3023_v44 = vpop.f32.mrf.mxu0 }
 0xc4f   :  { %3197 = vrot.lane.b32.xlu0 %v3023_v44, %s4250_s12 }
 0xc50   :  { %v4060_v45 = vpop.f32.mrf.mxu0 }
 0xc52   :  { %v3188_v46 = vpop.f32.mrf.mxu0 }
 0xc53   :  { %3201 = vrot.lane.b32.xlu1 %v3188_v46, %s4251_s3 }
 0xc54   :  { %v4070_v49 = vpop.f32.mrf.mxu0 }
 0xc55   :  { %v3345_v49 = vsub.s32 7, %v4316_v7 }
 0xc57   :  { %v3346_v51 = vrot.slane %v4212_v16, %v3345_v49 }
 0xc80   :  { %v2520_v54 = vpop.permute.xlu0 %2519 }
 0xc81   :  { %v2530_v59 = vsel %vm277_vm4, %v2019_v10, %v2520_v54  ;;  %v3374_v10 = vld [vmem:[%s4876_s6] sm:$0xff] }
 0xc84   :  { %v2524_v55 = vpop.permute.xlu1 %2523 }
 0xc85   :  { %v2531_v63 = vsel %vm947_vm5, %v2530_v59, %v2524_v55 }
 0xc88   :  { %v2528_v60 = vpop.permute.xlu1 %2527 }
 0xc89   :  { %v2532_v0 = vsel %vm949_vm6, %v2531_v63, %v2528_v60 }
 0xc8a   :  { %3209 = vrot.lane.b32.xlu0 %v2532_v0, %s4252_s1 }
 0xcbd   :  { %v3194_v2 = vpop.permute.xlu0 %3193 }
 0xcbe   :  { %v3204_v4 = vsel %vm277_vm4, %v2693_v40, %v3194_v2 }
 0xcc1   :  { %v3198_v3 = vpop.permute.xlu0 %3197 }
 0xcc2   :  { %v3205_v5 = vsel %vm947_vm5, %v3204_v4, %v3198_v3 }
 0xcc5   :  { %v3202_v6 = vpop.permute.xlu1 %3201 }
 0xcc6   :  { %v3206_v9 = vsel %vm949_vm6, %v3205_v5, %v3202_v6 }
 0xcc7   :  { %3211 = vrot.lane.b32.xlu1 %v3206_v9, %s4252_s1 }
 0xcfc   :  { %v3210_v8 = vpop.permute.xlu0 %3209 }
 0xcfd   :  { %v3215_v11 = vsel %vm145_vm2, %v4594_v31, %v3210_v8 }
 0xcfe   :  { %4087 = vmatprep.mubr.msk.f32.mxu1 %vm1647_vm7, %v3215_v11 }
 0xd39   :  { %v3212_v13 = vpop.permute.xlu1 %3211 }
 0xd3a   :  { %v3216_v14 = vsel %vm145_vm2, %v4598_v33, %v3212_v13 }
 0xd3b   :  { %4088 = vmatmul.mubr.msk.f32.vlgmr.msra.gmra.mxu1 %vm1647_vm7, %v3216_v14 }
 0xdfb   :  { %v4089_v18 = vpop.f32.mrf.mxu1 }
 0xdfc   :  { %v3308_v19 = vadd.f32 %v4089_v18, %v3229_v17 }
 0xdfd   :  { %v3302_v20 = vpop.f32.mrf.mxu1 }
 0xdfe   :  { %v3312_v22 = vadd.f32 %v3308_v19, %v4598_v33  ;;  %v3303_v23 = vadd.f32 %v3302_v20, %v3229_v17  ;;  %v3377_v33 = vld [vmem:[%s4876_s6 + $0x18] sm:$0xff] }
 0xdff   :  { %4091 = vmatpush3.msra.mxu0 %v3377_v33 }
 0xe00   :  { %v3311_v24 = vadd.f32 %v3303_v23, %v4594_v31  ;;  %v3316_v25 = vsel %vm145_vm2, %v3312_v22, 0.0  ;;  %v3322_v29 = vmul.f32 %v3312_v22, %v3312_v22  ;;  %v3376_v31 = vld [vmem:[%s4876_s6 + $0x10] sm:$0xff]  ;;  %4092 = vmatprep.subr.mxu0 %v4236_v61 }
 0xe01   :  { %3317 = vadd.xlane.f32.xlu1 %v3316_v25  ;;  %4093 = vmatpush3.msra.mxu0 %v3376_v31  ;;  %v3381_v25 = vrot.slane %v4588_v21, %v179_v47  ;;  %v4253_v47 = vmov 1966171168  }
 0xe02   :  { %v3313_v26 = vsel %vm145_vm2, %v3311_v24, 0.0  ;;  %v3321_v27 = vmul.f32 %v3311_v24, %v3311_v24  ;;  %v3326_v30 = vsel %vm145_vm2, %v3322_v29, 0.0  ;;  %4094 = vmatprep.subr.mxu0 %v4236_v61 }
 0xe03   :  { %3314 = vadd.xlane.f32.xlu0 %v3313_v26  ;;  %4095 = vmatpush3.msra.mxu0 %v3375_v32 }
 0xe04   :  { %v3323_v28 = vsel %vm145_vm2, %v3321_v27, 0.0  ;;  %4096 = vmatprep.subr.mxu0 %v4236_v61 }
 0xe05   :  { %4097 = vmatpush3.msra.mxu0 %v3374_v10 }
 0xe06   :  { %4101 = vmatprep.subr.mxu0 %v4236_v61 }
 0xe07   :  { %3324 = vadd.xlane.f32.xlu0 %v3323_v28 }
 0xe0b   :  { %3327 = vadd.xlane.f32.xlu0 %v3326_v30 }
 0xe12   :  { %3476 = vrot.lane.b32.xlu1 %v3377_v33, %s4239_s23 }
 0xe16   :  { %3472 = vrot.lane.b32.xlu1 %v3375_v32, %s4239_s23 }
 0xe1a   :  { %3470 = vrot.lane.b32.xlu1 %v3374_v10, %s4239_s23 }
 0xe21   :  { %3474 = vrot.lane.b32.xlu0 %v3376_v31, %s4239_s23 }
 0xe8a   :  { %v3318_v36 = vpop.xlane.xlu1 %3317 }
 0xe8b   :  { %v3320_v62 = vmul.f32 0.03125, %v3318_v36  ;;  %v3562_v36 = vunpack.c.l.s4 %v4253_v47 }
 0xe8c   :  { %v3315_v34 = vpop.xlane.xlu0 %3314 }
 0xe8d   :  { %v3319_v35 = vmul.f32 0.03125, %v3315_v34  ;;  %v3334_v42 = vmul.f32 %v3320_v62, %v3320_v62  ;;  %v3332_v55 = vsub.f32 %v3312_v22, %v3320_v62 }
 0xe8e   :  { %v3477_v16 = vpop.permute.xlu1 %3476 }
 0xe8f   :  { %v3333_v38 = vmul.f32 %v3319_v35, %v3319_v35  ;;  %v3331_v50 = vsub.f32 %v3311_v24, %v3319_v35  ;;  %v3457_v24 = vrot.slane %v4588_v21, 1 }
 0xe90   :  { %v3325_v37 = vpop.xlane.xlu0 %3324 }
 0xe91   :  { %v3329_v39 = vmul.f32 0.03125, %v3325_v37  ;;  %3458 = vrot.lane.b32.xlu0 %v3457_v24, %s4252_s1  ;;  %v3563_v37 = vunpack.c.0.s8 %v3562_v36 }
 0xe92   :  { %v3473_v22 = vpop.permute.xlu1 %3472 }
 0xe93   :  { %v3335_v40 = vsub.f32 %v3329_v39, %v3333_v38  ;;  %v3566_v62 = vsub.s32 %v3563_v37, %v4316_v7  ;;  %v3556_v7 = vld [vmem:[%s4872_s2 + $0x1] sm:$0x1] }
 0xe94   :  { %v3328_v41 = vpop.xlane.xlu0 %3327 }
 0xe95   :  { %v3337_v43 = vadd.f32 1e-05, %v3335_v40  ;;  %v3330_v44 = vmul.f32 0.03125, %v3328_v41 }
 0xe96   :  { %v3471_v23 = vpop.permute.xlu1 %3470 }
 0xe97   :  { %4206 = vrsqrt.f32 %v3337_v43  ;;  %v3336_v45 = vsub.f32 %v3330_v44, %v3334_v42  ;;  %v3555_v42 = vld [vmem:[%s4872_s2] sm:$0x1] }
 0xe98   :  { %v3475_v20 = vpop.permute.xlu0 %3474 }
 0xe99   :  { %v3338_v46 = vadd.f32 1e-05, %v3336_v45 }
 0xe9b   :  { %4208 = vrsqrt.f32 %v3338_v46 }
 0xea4   :  { %v4207_v52 = vpop.eup %4206 }
 0xea5   :  { %v3341_v54 = vmul.f32 %v4207_v52, %v3331_v50 }
 0xea7   :  { %v3347_v56 = vmul.f32 %v3346_v51, %v3341_v54 }
 0xea8   :  { %v4209_v57 = vpop.eup %4208 }
 0xea9   :  { %v3342_v59 = vmul.f32 %v4209_v57, %v3332_v55  ;;  %v3353_v63 = vadd.f32 %v3352_v53, %v3347_v56 }
 0xeab   :  { %v3348_v60 = vmul.f32 %v3346_v51, %v3342_v59  ;;  %v3355_v58 = vsel %vm145_vm2, %v3353_v63, 0.0 }
 0xeac   :  { %v3356_v0 = vrot.slane %v3355_v58, 4 }
 0xead   :  { %v3354_v1 = vadd.f32 %v3352_v53, %v3348_v60 }
 0xeae   :  { %v3357_v2 = vadd.f32 %v3356_v0, %v3355_v58 }
 0xeaf   :  { %v3364_v3 = vsel %vm145_vm2, %v3354_v1, 0.0 }
 0xeb0   :  { %v3358_v4 = vrot.slane %v3357_v2, 2  ;;  %v3365_v5 = vrot.slane %v3364_v3, 4 }
 0xeb2   :  { %v3359_v6 = vadd.f32 %v3358_v4, %v3357_v2  ;;  %v3366_v9 = vadd.f32 %v3365_v5, %v3364_v3 }
 0xeb4   :  { %v3360_v8 = vrot.slane %v3359_v6, 1  ;;  %v3367_v12 = vrot.slane %v3366_v9, 2 }
 0xeb6   :  { %v3368_v11 = vadd.f32 %v3367_v12, %v3366_v9  ;;  %v3361_v13 = vadd.f32 %v3360_v8, %v3359_v6 }
 0xeb8   :  { %v3369_v14 = vrot.slane %v3368_v11, 1  ;;  %v3363_v17 = vmul.f32 0.125, %v3361_v13 }
 0xeba   :  { %v3370_v15 = vadd.f32 %v3369_v14, %v3368_v11 }
 0xebc   :  { %v3371_v18 = vmul.f32 0.125, %v3370_v15 }
 0xebe   :  { %v3373_v19 = vsel %vm3372_vm8, %v3363_v17, %v3371_v18 }
 0xebf   :  { %4099 = vmatmul.mubr.msk.f32.vlgmr.msra.gmra.mxu0 %vm145_vm2, %v3373_v19 }
 0xec0   :  { %4102 = vmatpush3.msra.mxu0 %v3477_v16  ;;  %4109 = vmatprep.mubr.msk.f32.mxu0 %vm4237_vm3, %v4236_v61 }
 0xec1   :  { %4103 = vmatprep.subr.mxu0 %v4236_v61 }
 0xec2   :  { %4104 = vmatpush3.msra.mxu0 %v3475_v20 }
 0xec3   :  { %4105 = vmatprep.subr.mxu0 %v4236_v61 }
 0xec4   :  { %4106 = vmatpush3.msra.mxu0 %v3473_v22 }
 0xec5   :  { %4107 = vmatprep.subr.mxu0 %v4236_v61 }
 0xec6   :  { %4108 = vmatpush3.msra.mxu0 %v3471_v23 }
 0xf03   :  { %v3459_v30 = vpop.permute.xlu0 %3458 }
 0xf04   :  { %v3461_v61 = vsel %vm145_vm2, %v4588_v21, %v3459_v30 }
 0xf05   :  { %v3465_v33 = vrot.slane %v3461_v61, %v185_v48 }
 0xf7f   :  { %v3451_v26 = vpop.f32.mrf.mxu0 }
 0xf80   :  { %v3452_v27 = vadd.f32 %v3451_v26, %v3381_v25 }
 0xf81   :  { %v4100_v28 = vpop.f32.mrf.mxu0 }
 0xf82   :  { %v3455_v29 = vmax.f32 %v3452_v27, 0.0 }
 0xf84   :  { %4110 = vmatmul.mubr.msk.f32.vlgmr.msra.gmra.mxu0 %vm145_vm2, %v3455_v29 }
0x1044   :  { %v3551_v31 = vpop.f32.mrf.mxu0 }
0x1045   :  { %v3552_v32 = vadd.f32 %v3551_v31, %v3465_v33 }
0x1046   :  { %v4111_v10 = vpop.f32.mrf.mxu0 }
0x1047   :  { %v3557_v34 = vmul.f32 0.5, %v3552_v32  ;;  %v3598_v48 = vrot.slane %v3552_v32, %v3566_v62 }
0x1049   :  { %v3558_v35 = vmul.f32 1.442695, %v3557_v34  ;;  %v3599_v43 = vcombine.high %v3598_v48, %v3598_v48  ;;  %v3606_v49 = vrot.slane %v3598_v48, %v3566_v62 }
0x104b   :  { %4210 = vpow2.f32 %v3558_v35  ;;  %v3613_v50 = vrot.slane %v3599_v43, %v3566_v62 }
0x1058   :  { %v4211_v38 = vpop.eup %4210 }
0x1059   :  { %v3567_v39 = vrot.slane %v4211_v38, %v3566_v62 }
0x105b   :  { %v3575_v40 = vrot.slane %v3567_v39, %v3566_v62  ;;  %v3568_v41 = vcombine.high %v3567_v39, %v3567_v39 }
0x105d   :  { %3583 = vrot.lane.b32.xlu1 %v3575_v40, %s4239_s23  ;;  %v3582_v21 = vrot.slane %v3568_v41, %v3566_v62 }
0x105f   :  { %3585 = vrot.lane.b32.xlu0 %v3582_v21, %s4239_s23  ;;  %s4254_s23 = smov [#allocation2]  }
0x1060   :  { %s3672_s27 = sshll.u32 %s4254_s23, 4  ;;  %s3673_s27 = int_to_ptr.vmem [resolvable:$true] %s3672_s27 }
0x1061   :  { %s4213_s2 = scalar_lea.vmem %s3673_s27, 32  ;;  %p4218_p1 = scmp.lt.s32.totalorder %s3673_s27, %s3673_s27 }
0x1062   :  { %p4214_p0 = scmp.ne.s32.totalorder %s3673_s27, %s4213_s2  ;;  %p4219_p2 = scmp.lt.s32.totalorder %s4213_s2, %s4213_s2 }
0x1064   :  { %p4220_p3 = por %p4219_p2, %p4218_p1 }
0x1066   :  { %p4221_p4 = pnand %p4220_p3, %p4214_p0 }
0x10cf   :  { %v3584_v44 = vpop.permute.xlu1 %3583 }
0x10d0   :  { %v3589_v45 = vmul.f32 %v3584_v44, %v3555_v42 }
0x10d1   :  { %v3586_v46 = vpop.permute.xlu0 %3585 }
0x10d2   :  { %v3590_v51 = vmul.f32 %v3586_v46, %v3556_v7  ;;  %v3616_v52 = vadd.f32 %v3606_v49, %v3589_v45 }
0x10d4   :  { %v3617_v53 = vadd.f32 %v3613_v50, %v3590_v51 }
0x10d6   :  { %v3620_v54 = vcombine.low %v3616_v52, %v3617_v53 }
0x10d8   :  { %v3627_v55 = vrot.slane %v3620_v54, %v3566_v62 }
0x10da   :  { %v3634_v56 = vrot.slane %v3627_v55, %v3566_v62 }
0x10dc   :  { %3635 = vrot.lane.b32.xlu1 %v3634_v56, %s4244_s28 }
0x114e   :  { %v3636_v57 = vpop.permute.xlu1 %3635 }
0x114f   :  { %v3638_v59 = vsel %vm1647_vm7, %v3552_v32, %v3636_v57 }
0x1150   :  { %v3646_v63 = vrot.slane %v3638_v59, %v3566_v62 }
0x1152   :  { %v3647_v60 = vcombine.high %v3646_v63, %v3646_v63  ;;  %v3654_v58 = vrot.slane %v3646_v63, %v3566_v62 }
0x1154   :  { %v3661_v0 = vrot.slane %v3647_v60, %v3566_v62  ;;  %3665 = vst.msk [vmem:[#allocation2] sm:$0x1] %vm3664_vm9, %v3654_v58 }
0x1156   :  { %3666 = vst.msk [vmem:[#allocation2 + $0x1] sm:$0x1] %vm3664_vm9, %v3661_v0 }
0x1157   :  { %4224 = shalt.err (!%p4221_p4)
}
0x1158   :  { %s4255_s28 = smov 1  }
0x1159   :  { %3678 = dma.vmem_to_hbm [thread:$0]  %s3673_s27, 32, %s4878_s8, [#allocation3], %s4250_s12, %s4250_s12, %s4255_s28  }
0x115a   :  { %4233 = dma.done.wait [#allocation3], 32  }
0x115b   :  { %4234 = vsyncadd [#allocation3], 4294967264 }
0x115c   :  { %3682 = vsyncpa [#allocation3], 1 }

</bundles_post_ra>
